<compile_context>
chip_gen: v7x
topology: tpu7x:2x2x1
jax: 0.10.0
libtpu: 0.0.40
codegen_flags: <defaults>
</compile_context>

<pallas_src>
import functools

import jax
import jax.numpy as jnp
from jax.experimental import pallas as pl
from jax.experimental.pallas import tpu as pltpu


# ------------------------------- fused kernel ------------------------------- #

def _convblock_kernel(x_ref, w1_ref, b1_ref, w2_ref, b2_ref, w3_ref, b3_ref,
                      ws_ref, bs_ref, o_ref, pad_ref, *, H, W, K, final_relu):
    """One image per grid step; every intermediate stays in VMEM."""
    f1 = w1_ref.shape[1]
    f2 = w2_ref.shape[2]

    x2d = x_ref[0]                                                    # [H*W, Cin]

    # conv1 (1x1, BN scale folded into w1) + bias + ReLU
    out1 = jnp.dot(x2d, w1_ref[...], preferred_element_type=jnp.float32)
    out1 = jnp.maximum(out1 + b1_ref[...], 0.0)                       # [H*W, F1]

    # zero-padded spatial copy of out1 for the KxK conv (padding=1)
    pad_ref[...] = jnp.zeros_like(pad_ref)
    pad_ref[pl.ds(1, H), pl.ds(1, W), :] = out1.reshape(H, W, f1)

    # conv2 (KxK, stride=1, padding=1) as K*K accumulated matmuls over shifted
    # windows of the padded scratch -- the kxk reduction never leaves VMEM.
    acc = jnp.zeros((H * W, f2), jnp.float32)
    for kh in range(K):
        for kw in range(K):
            window = pad_ref[pl.ds(kh, H), pl.ds(kw, W), :].reshape(H * W, f1)
            acc += jnp.dot(window, w2_ref[kh * K + kw],
                           preferred_element_type=jnp.float32)
    out2 = jnp.maximum(acc + b2_ref[...], 0.0)                        # [H*W, F2]

    # shortcut: 1x1 conv (BN folded) on the block input
    sc = jnp.dot(x2d, ws_ref[...], preferred_element_type=jnp.float32) + bs_ref[...]

    # conv3 (1x1, BN folded) + residual add (+ optional final ReLU)
    out3 = jnp.dot(out2, w3_ref[...], preferred_element_type=jnp.float32)
    out3 = out3 + b3_ref[...] + sc
    if final_relu:
        out3 = jnp.maximum(out3, 0.0)
    o_ref[0] = out3.astype(o_ref.dtype)


def conv_block_forward(x_nchw, mm, *, kernel_size=3, stride=1, final_relu=True):
    """Fused ConvBlock forward. x_nchw: [N, Cin, H, W] (PyTorch layout)."""
    # TODO(synk): general stride support (strided pl.ds windows + strided shortcut).
    assert stride == 1, "fused kernel currently implements stride=1 only"
    n, cin, h, w = x_nchw.shape
    k = kernel_size
    f1 = mm["w1s"].shape[1]
    f2 = mm["w2s"].shape[2]
    f3 = mm["w3s"].shape[1]

    # NHWC rows layout [N, H*W, Cin] -- wrapper glue only.
    x_rows = jnp.transpose(x_nchw, (0, 2, 3, 1)).reshape(n, h * w, cin)

    out = pl.pallas_call(
        functools.partial(_convblock_kernel, H=h, W=w, K=k, final_relu=final_relu),
        out_shape=jax.ShapeDtypeStruct((n, h * w, f3), jnp.float32),
        grid=(n,),
        in_specs=[
            pl.BlockSpec((1, h * w, cin), lambda i: (i, 0, 0)),   # x (one image)
            pl.BlockSpec((cin, f1), lambda i: (0, 0)),            # w1 * s1
            pl.BlockSpec((1, f1), lambda i: (0, 0)),              # b1
            pl.BlockSpec((k * k, f1, f2), lambda i: (0, 0, 0)),   # w2 * s2 (per tap)
            pl.BlockSpec((1, f2), lambda i: (0, 0)),              # b2
            pl.BlockSpec((f2, f3), lambda i: (0, 0)),             # w3 * s3
            pl.BlockSpec((1, f3), lambda i: (0, 0)),              # b3
            pl.BlockSpec((cin, f3), lambda i: (0, 0)),            # ws * ss
            pl.BlockSpec((1, f3), lambda i: (0, 0)),              # bs
        ],
        out_specs=pl.BlockSpec((1, h * w, f3), lambda i: (i, 0, 0)),
        scratch_shapes=[pltpu.VMEM((h + 2, w + 2, f1), jnp.float32)],
        compiler_params=pltpu.CompilerParams(dimension_semantics=("parallel",)),
    )(x_rows,
      mm["w1s"], mm["b1"].reshape(1, f1),
      mm["w2s"], mm["b2"].reshape(1, f2),
      mm["w3s"], mm["b3"].reshape(1, f3),
      mm["wss"], mm["bs"].reshape(1, f3))

    out = out.reshape(n, h, w, f3)
    return jnp.transpose(out, (0, 3, 1, 2))          # back to NCHW


# --------------------------- parameter construction ------------------------ #

def _bn_fold(c, idx, batchnorm):
    """Deterministic synthetic BN params folded to (scale, bias)."""
    if not batchnorm:
        return jnp.ones((c,), jnp.float32), jnp.zeros((c,), jnp.float32)
    r = jnp.arange(c, dtype=jnp.float32)
    gamma = 1.0 + 0.01 * (r + idx)
    beta = 0.01 * (r - idx) - 0.05
    mean = 0.02 * r
    var = 1.0 + 0.03 * r
    eps = 1e-5
    scale = gamma / jnp.sqrt(var + eps)
    bias = beta - mean * scale
    return scale, bias


def init_convblock_params(key, in_planes, filters, kernel_size, batchnorm=True):
    f1, f2, f3 = filters
    k1, k2, k3, k4 = jax.random.split(key, 4)

    def conv_w(k, cout, cin, kh, kw):  # OIHW, PyTorch convention
        fan_in = cin * kh * kw
        return jax.random.normal(k, (cout, cin, kh, kw), jnp.float32) / jnp.sqrt(fan_in)

    raw = {
        "w1": conv_w(k1, f1, in_planes, 1, 1),
        "w2": conv_w(k2, f2, f1, kernel_size, kernel_size),
        "w3": conv_w(k3, f3, f2, 1, 1),
        "ws": conv_w(k4, f3, in_planes, 1, 1),
    }
    raw["s1"], raw["b1"] = _bn_fold(f1, 1, batchnorm)
    raw["s2"], raw["b2"] = _bn_fold(f2, 2, batchnorm)
    raw["s3"], raw["b3"] = _bn_fold(f3, 3, batchnorm)
    raw["ss"], raw["bs"] = _bn_fold(f3, 4, batchnorm)

    # Kernel-form weights with the BN scale folded into the output-channel
    # columns; the in-kernel epilogue is then just "+ bias".
    mm = {
        "w1s": raw["w1"][:, :, 0, 0].T * raw["s1"][None, :],          # [Cin, F1]
        "w3s": raw["w3"][:, :, 0, 0].T * raw["s3"][None, :],          # [F2,  F3]
        "wss": raw["ws"][:, :, 0, 0].T * raw["ss"][None, :],          # [Cin, F3]
        # [F2, F1, kh, kw] -> [kh, kw, F1, F2] (scaled) -> [kh*kw, F1, F2]
        "w2s": (jnp.transpose(raw["w2"], (2, 3, 1, 0))
                * raw["s2"][None, None, None, :]
                ).reshape(kernel_size * kernel_size, f1, f2),
        "b1": raw["b1"], "b2": raw["b2"], "b3": raw["b3"], "bs": raw["bs"],
    }
    return raw, mm


# ------------------------------ plain-JAX reference ------------------------- #

def reference_forward(x, raw, *, kernel_size=3, stride=1, final_relu=True):
    def conv(x, w, s=1, p=0):
        return jax.lax.conv_general_dilated(
            x, w, (s, s), [(p, p), (p, p)],
            dimension_numbers=("NCHW", "OIHW", "NCHW"))

    def bn(x, scale, bias):
        return x * scale[None, :, None, None] + bias[None, :, None, None]

    out = jax.nn.relu(bn(conv(x, raw["w1"]), raw["s1"], raw["b1"]))
    out = jax.nn.relu(bn(conv(out, raw["w2"], stride, 1), raw["s2"], raw["b2"]))
    out = bn(conv(out, raw["w3"]), raw["s3"], raw["b3"])
    out = out + bn(conv(x, raw["ws"], stride), raw["ss"], raw["bs"])
    if final_relu:
        out = jax.nn.relu(out)
    return out


# ----------------------------------- main ----------------------------------- #

if __name__ == "__main__":
    key = jax.random.PRNGKey(0)
    kx, kp = jax.random.split(key)

    # ConvBlock(in_planes=4, filters=(8, 8, 16), kernel_size=3, stride=1)
    in_planes, filters, kernel_size, stride = 4, (8, 8, 16), 3, 1
    x = jax.random.normal(kx, (2, in_planes, 16, 16), jnp.float32)  # NCHW, like PyTorch

    raw, mm = init_convblock_params(kp, in_planes, filters, kernel_size, batchnorm=True)

    out = conv_block_forward(x, mm, kernel_size=kernel_size, stride=stride,
                             final_relu=True)
    out = jax.block_until_ready(out)

    ref = reference_forward(x, raw, kernel_size=kernel_size, stride=stride,
                            final_relu=True)
    ref = jax.block_until_ready(ref)

    assert out.shape == ref.shape == (2, filters[2], 16, 16)
    assert jnp.allclose(out, ref, atol=1e-4, rtol=1e-4), float(
        jnp.max(jnp.abs(out - ref)))
    print("KERNEL_OK")
</pallas_src>

<mosaic_0001>
module attributes {stable_mosaic.version = 11 : i64} {
  func.func @_convblock_kernel(%arg0: i32, %arg1: memref<1x256x4xf32, #tpu.memory_space<vmem>>, %arg2: memref<4x8xf32, #tpu.memory_space<vmem>>, %arg3: memref<1x8xf32, #tpu.memory_space<vmem>>, %arg4: memref<9x8x8xf32, #tpu.memory_space<vmem>>, %arg5: memref<1x8xf32, #tpu.memory_space<vmem>>, %arg6: memref<8x16xf32, #tpu.memory_space<vmem>>, %arg7: memref<1x16xf32, #tpu.memory_space<vmem>>, %arg8: memref<4x16xf32, #tpu.memory_space<vmem>>, %arg9: memref<1x16xf32, #tpu.memory_space<vmem>>, %arg10: memref<1x256x16xf32, #tpu.memory_space<vmem>>, %arg11: memref<18x18x8xf32, #tpu.memory_space<vmem>>) attributes {dimension_semantics = [#tpu.dimension_semantics<parallel>], iteration_bounds = array<i64: 2>, scalar_prefetch = 0 : i64, scratch_operands = 1 : i64, tpu.core_type = #tpu.core_type<tc>, window_params = [{transform_indices = @transform_0, window_bounds = array<i64: 1, 256, 4>}, {pipeline_mode = #tpu.pipeline_mode<synchronous>, transform_indices = @transform_1, window_bounds = array<i64: 4, 8>}, {pipeline_mode = #tpu.pipeline_mode<synchronous>, transform_indices = @transform_2, window_bounds = array<i64: 1, 8>}, {pipeline_mode = #tpu.pipeline_mode<synchronous>, transform_indices = @transform_3, window_bounds = array<i64: 9, 8, 8>}, {pipeline_mode = #tpu.pipeline_mode<synchronous>, transform_indices = @transform_4, window_bounds = array<i64: 1, 8>}, {pipeline_mode = #tpu.pipeline_mode<synchronous>, transform_indices = @transform_5, window_bounds = array<i64: 8, 16>}, {pipeline_mode = #tpu.pipeline_mode<synchronous>, transform_indices = @transform_6, window_bounds = array<i64: 1, 16>}, {pipeline_mode = #tpu.pipeline_mode<synchronous>, transform_indices = @transform_7, window_bounds = array<i64: 4, 16>}, {pipeline_mode = #tpu.pipeline_mode<synchronous>, transform_indices = @transform_8, window_bounds = array<i64: 1, 16>}, {transform_indices = @transform_9, window_bounds = array<i64: 1, 256, 16>}]} {
    %c0 = arith.constant 0 : index
    %c0_0 = arith.constant 0 : index
    %c0_1 = arith.constant 0 : index
    %0 = vector.load %arg1[%c0, %c0_0, %c0_1] : memref<1x256x4xf32, #tpu.memory_space<vmem>>, vector<1x256x4xf32>
    %1 = vector.shape_cast %0 : vector<1x256x4xf32> to vector<256x4xf32>
    %c0_2 = arith.constant 0 : index
    %c0_3 = arith.constant 0 : index
    %2 = vector.load %arg2[%c0_2, %c0_3] : memref<4x8xf32, #tpu.memory_space<vmem>>, vector<4x8xf32>
    %cst = arith.constant dense<0.000000e+00> : vector<256x8xf32>
    %3 = tpu.matmul %1, %2, %cst {dimension_numbers = #tpu.dot_dimension_numbers<[1], [0], [0], [1], [0, 0, 1, 1], [], []>} : vector<256x4xf32>, vector<4x8xf32>, vector<256x8xf32> -> vector<256x8xf32>
    %c0_4 = arith.constant 0 : index
    %c0_5 = arith.constant 0 : index
    %4 = vector.load %arg3[%c0_4, %c0_5] : memref<1x8xf32, #tpu.memory_space<vmem>>, vector<1x8xf32>
    %5 = vector.broadcast %4 : vector<1x8xf32> to vector<256x8xf32>
    %6 = arith.addf %3, %5 : vector<256x8xf32>
    %cst_6 = arith.constant 0.000000e+00 : f32
    %7 = vector.broadcast %cst_6 : f32 to vector<256x8xf32>
    %8 = arith.maximumf %6, %7 : vector<256x8xf32>
    %cst_7 = arith.constant 0.000000e+00 : f32
    %9 = vector.broadcast %cst_7 : f32 to vector<18x18x8xf32>
    %c0_8 = arith.constant 0 : index
    %c0_9 = arith.constant 0 : index
    %c0_10 = arith.constant 0 : index
    %10 = vector.load %arg11[%c0_8, %c0_9, %c0_10] : memref<18x18x8xf32, #tpu.memory_space<vmem>>, vector<18x18x8xf32>
    tpu.vector_store %arg11[%c0_8, %c0_9, %c0_10], %9 {strides = array<i32>} : memref<18x18x8xf32, #tpu.memory_space<vmem>>, vector<18x18x8xf32>,
    %11 = vector.shape_cast %8 : vector<256x8xf32> to vector<16x16x8xf32>
    %c1 = arith.constant 1 : index
    %c1_11 = arith.constant 1 : index
    %c0_12 = arith.constant 0 : index
    %12 = vector.load %arg11[%c1, %c1_11, %c0_12] : memref<18x18x8xf32, #tpu.memory_space<vmem>>, vector<16x16x8xf32>
    tpu.vector_store %arg11[%c1, %c1_11, %c0_12], %11 {strides = array<i32>} : memref<18x18x8xf32, #tpu.memory_space<vmem>>, vector<16x16x8xf32>,
    %cst_13 = arith.constant 0.000000e+00 : f32
    %13 = vector.broadcast %cst_13 : f32 to vector<256x8xf32>
    %c0_14 = arith.constant 0 : index
    %c0_15 = arith.constant 0 : index
    %c0_16 = arith.constant 0 : index
    %14 = vector.load %arg11[%c0_14, %c0_15, %c0_16] : memref<18x18x8xf32, #tpu.memory_space<vmem>>, vector<16x16x8xf32>
    %15 = vector.shape_cast %14 : vector<16x16x8xf32> to vector<256x8xf32>
    %c0_17 = arith.constant 0 : index
    %c0_18 = arith.constant 0 : index
    %c0_19 = arith.constant 0 : index
    %16 = vector.load %arg4[%c0_17, %c0_18, %c0_19] : memref<9x8x8xf32, #tpu.memory_space<vmem>>, vector<1x8x8xf32>
    %17 = vector.shape_cast %16 : vector<1x8x8xf32> to vector<8x8xf32>
    %cst_20 = arith.constant dense<0.000000e+00> : vector<256x8xf32>
    %18 = tpu.matmul %15, %17, %cst_20 {dimension_numbers = #tpu.dot_dimension_numbers<[1], [0], [0], [1], [0, 0, 1, 1], [], []>} : vector<256x8xf32>, vector<8x8xf32>, vector<256x8xf32> -> vector<256x8xf32>
    %19 = arith.addf %13, %18 : vector<256x8xf32>
    %c0_21 = arith.constant 0 : index
    %c1_22 = arith.constant 1 : index
    %c0_23 = arith.constant 0 : index
    %20 = vector.load %arg11[%c0_21, %c1_22, %c0_23] : memref<18x18x8xf32, #tpu.memory_space<vmem>>, vector<16x16x8xf32>
    %21 = vector.shape_cast %20 : vector<16x16x8xf32> to vector<256x8xf32>
    %c1_24 = arith.constant 1 : index
    %c0_25 = arith.constant 0 : index
    %c0_26 = arith.constant 0 : index
    %22 = vector.load %arg4[%c1_24, %c0_25, %c0_26] : memref<9x8x8xf32, #tpu.memory_space<vmem>>, vector<1x8x8xf32>
    %23 = vector.shape_cast %22 : vector<1x8x8xf32> to vector<8x8xf32>
    %cst_27 = arith.constant dense<0.000000e+00> : vector<256x8xf32>
    %24 = tpu.matmul %21, %23, %cst_27 {dimension_numbers = #tpu.dot_dimension_numbers<[1], [0], [0], [1], [0, 0, 1, 1], [], []>} : vector<256x8xf32>, vector<8x8xf32>, vector<256x8xf32> -> vector<256x8xf32>
    %25 = arith.addf %19, %24 : vector<256x8xf32>
    %c0_28 = arith.constant 0 : index
    %c2 = arith.constant 2 : index
    %c0_29 = arith.constant 0 : index
    %26 = vector.load %arg11[%c0_28, %c2, %c0_29] : memref<18x18x8xf32, #tpu.memory_space<vmem>>, vector<16x16x8xf32>
    %27 = vector.shape_cast %26 : vector<16x16x8xf32> to vector<256x8xf32>
    %c2_30 = arith.constant 2 : index
    %c0_31 = arith.constant 0 : index
    %c0_32 = arith.constant 0 : index
    %28 = vector.load %arg4[%c2_30, %c0_31, %c0_32] : memref<9x8x8xf32, #tpu.memory_space<vmem>>, vector<1x8x8xf32>
    %29 = vector.shape_cast %28 : vector<1x8x8xf32> to vector<8x8xf32>
    %cst_33 = arith.constant dense<0.000000e+00> : vector<256x8xf32>
    %30 = tpu.matmul %27, %29, %cst_33 {dimension_numbers = #tpu.dot_dimension_numbers<[1], [0], [0], [1], [0, 0, 1, 1], [], []>} : vector<256x8xf32>, vector<8x8xf32>, vector<256x8xf32> -> vector<256x8xf32>
    %31 = arith.addf %25, %30 : vector<256x8xf32>
    %c1_34 = arith.constant 1 : index
    %c0_35 = arith.constant 0 : index
    %c0_36 = arith.constant 0 : index
    %32 = vector.load %arg11[%c1_34, %c0_35, %c0_36] : memref<18x18x8xf32, #tpu.memory_space<vmem>>, vector<16x16x8xf32>
    %33 = vector.shape_cast %32 : vector<16x16x8xf32> to vector<256x8xf32>
    %c3 = arith.constant 3 : index
    %c0_37 = arith.constant 0 : index
    %c0_38 = arith.constant 0 : index
    %34 = vector.load %arg4[%c3, %c0_37, %c0_38] : memref<9x8x8xf32, #tpu.memory_space<vmem>>, vector<1x8x8xf32>
    %35 = vector.shape_cast %34 : vector<1x8x8xf32> to vector<8x8xf32>
    %cst_39 = arith.constant dense<0.000000e+00> : vector<256x8xf32>
    %36 = tpu.matmul %33, %35, %cst_39 {dimension_numbers = #tpu.dot_dimension_numbers<[1], [0], [0], [1], [0, 0, 1, 1], [], []>} : vector<256x8xf32>, vector<8x8xf32>, vector<256x8xf32> -> vector<256x8xf32>
    %37 = arith.addf %31, %36 : vector<256x8xf32>
    %c1_40 = arith.constant 1 : index
    %c1_41 = arith.constant 1 : index
    %c0_42 = arith.constant 0 : index
    %38 = vector.load %arg11[%c1_40, %c1_41, %c0_42] : memref<18x18x8xf32, #tpu.memory_space<vmem>>, vector<16x16x8xf32>
    %39 = vector.shape_cast %38 : vector<16x16x8xf32> to vector<256x8xf32>
    %c4 = arith.constant 4 : index
    %c0_43 = arith.constant 0 : index
    %c0_44 = arith.constant 0 : index
    %40 = vector.load %arg4[%c4, %c0_43, %c0_44] : memref<9x8x8xf32, #tpu.memory_space<vmem>>, vector<1x8x8xf32>
    %41 = vector.shape_cast %40 : vector<1x8x8xf32> to vector<8x8xf32>
    %cst_45 = arith.constant dense<0.000000e+00> : vector<256x8xf32>
    %42 = tpu.matmul %39, %41, %cst_45 {dimension_numbers = #tpu.dot_dimension_numbers<[1], [0], [0], [1], [0, 0, 1, 1], [], []>} : vector<256x8xf32>, vector<8x8xf32>, vector<256x8xf32> -> vector<256x8xf32>
    %43 = arith.addf %37, %42 : vector<256x8xf32>
    %c1_46 = arith.constant 1 : index
    %c2_47 = arith.constant 2 : index
    %c0_48 = arith.constant 0 : index
    %44 = vector.load %arg11[%c1_46, %c2_47, %c0_48] : memref<18x18x8xf32, #tpu.memory_space<vmem>>, vector<16x16x8xf32>
    %45 = vector.shape_cast %44 : vector<16x16x8xf32> to vector<256x8xf32>
    %c5 = arith.constant 5 : index
    %c0_49 = arith.constant 0 : index
    %c0_50 = arith.constant 0 : index
    %46 = vector.load %arg4[%c5, %c0_49, %c0_50] : memref<9x8x8xf32, #tpu.memory_space<vmem>>, vector<1x8x8xf32>
    %47 = vector.shape_cast %46 : vector<1x8x8xf32> to vector<8x8xf32>
    %cst_51 = arith.constant dense<0.000000e+00> : vector<256x8xf32>
    %48 = tpu.matmul %45, %47, %cst_51 {dimension_numbers = #tpu.dot_dimension_numbers<[1], [0], [0], [1], [0, 0, 1, 1], [], []>} : vector<256x8xf32>, vector<8x8xf32>, vector<256x8xf32> -> vector<256x8xf32>
    %49 = arith.addf %43, %48 : vector<256x8xf32>
    %c2_52 = arith.constant 2 : index
    %c0_53 = arith.constant 0 : index
    %c0_54 = arith.constant 0 : index
    %50 = vector.load %arg11[%c2_52, %c0_53, %c0_54] : memref<18x18x8xf32, #tpu.memory_space<vmem>>, vector<16x16x8xf32>
    %51 = vector.shape_cast %50 : vector<16x16x8xf32> to vector<256x8xf32>
    %c6 = arith.constant 6 : index
    %c0_55 = arith.constant 0 : index
    %c0_56 = arith.constant 0 : index
    %52 = vector.load %arg4[%c6, %c0_55, %c0_56] : memref<9x8x8xf32, #tpu.memory_space<vmem>>, vector<1x8x8xf32>
    %53 = vector.shape_cast %52 : vector<1x8x8xf32> to vector<8x8xf32>
    %cst_57 = arith.constant dense<0.000000e+00> : vector<256x8xf32>
    %54 = tpu.matmul %51, %53, %cst_57 {dimension_numbers = #tpu.dot_dimension_numbers<[1], [0], [0], [1], [0, 0, 1, 1], [], []>} : vector<256x8xf32>, vector<8x8xf32>, vector<256x8xf32> -> vector<256x8xf32>
    %55 = arith.addf %49, %54 : vector<256x8xf32>
    %c2_58 = arith.constant 2 : index
    %c1_59 = arith.constant 1 : index
    %c0_60 = arith.constant 0 : index
    %56 = vector.load %arg11[%c2_58, %c1_59, %c0_60] : memref<18x18x8xf32, #tpu.memory_space<vmem>>, vector<16x16x8xf32>
    %57 = vector.shape_cast %56 : vector<16x16x8xf32> to vector<256x8xf32>
    %c7 = arith.constant 7 : index
    %c0_61 = arith.constant 0 : index
    %c0_62 = arith.constant 0 : index
    %58 = vector.load %arg4[%c7, %c0_61, %c0_62] : memref<9x8x8xf32, #tpu.memory_space<vmem>>, vector<1x8x8xf32>
    %59 = vector.shape_cast %58 : vector<1x8x8xf32> to vector<8x8xf32>
    %cst_63 = arith.constant dense<0.000000e+00> : vector<256x8xf32>
    %60 = tpu.matmul %57, %59, %cst_63 {dimension_numbers = #tpu.dot_dimension_numbers<[1], [0], [0], [1], [0, 0, 1, 1], [], []>} : vector<256x8xf32>, vector<8x8xf32>, vector<256x8xf32> -> vector<256x8xf32>
    %61 = arith.addf %55, %60 : vector<256x8xf32>
    %c2_64 = arith.constant 2 : index
    %c2_65 = arith.constant 2 : index
    %c0_66 = arith.constant 0 : index
    %62 = vector.load %arg11[%c2_64, %c2_65, %c0_66] : memref<18x18x8xf32, #tpu.memory_space<vmem>>, vector<16x16x8xf32>
    %63 = vector.shape_cast %62 : vector<16x16x8xf32> to vector<256x8xf32>
    %c8 = arith.constant 8 : index
    %c0_67 = arith.constant 0 : index
    %c0_68 = arith.constant 0 : index
    %64 = vector.load %arg4[%c8, %c0_67, %c0_68] : memref<9x8x8xf32, #tpu.memory_space<vmem>>, vector<1x8x8xf32>
    %65 = vector.shape_cast %64 : vector<1x8x8xf32> to vector<8x8xf32>
    %cst_69 = arith.constant dense<0.000000e+00> : vector<256x8xf32>
    %66 = tpu.matmul %63, %65, %cst_69 {dimension_numbers = #tpu.dot_dimension_numbers<[1], [0], [0], [1], [0, 0, 1, 1], [], []>} : vector<256x8xf32>, vector<8x8xf32>, vector<256x8xf32> -> vector<256x8xf32>
    %67 = arith.addf %61, %66 : vector<256x8xf32>
    %c0_70 = arith.constant 0 : index
    %c0_71 = arith.constant 0 : index
    %68 = vector.load %arg5[%c0_70, %c0_71] : memref<1x8xf32, #tpu.memory_space<vmem>>, vector<1x8xf32>
    %69 = vector.broadcast %68 : vector<1x8xf32> to vector<256x8xf32>
    %70 = arith.addf %67, %69 : vector<256x8xf32>
    %cst_72 = arith.constant 0.000000e+00 : f32
    %71 = vector.broadcast %cst_72 : f32 to vector<256x8xf32>
    %72 = arith.maximumf %70, %71 : vector<256x8xf32>
    %c0_73 = arith.constant 0 : index
    %c0_74 = arith.constant 0 : index
    %73 = vector.load %arg8[%c0_73, %c0_74] : memref<4x16xf32, #tpu.memory_space<vmem>>, vector<4x16xf32>
    %cst_75 = arith.constant dense<0.000000e+00> : vector<256x16xf32>
    %74 = tpu.matmul %1, %73, %cst_75 {dimension_numbers = #tpu.dot_dimension_numbers<[1], [0], [0], [1], [0, 0, 1, 1], [], []>} : vector<256x4xf32>, vector<4x16xf32>, vector<256x16xf32> -> vector<256x16xf32>
    %c0_76 = arith.constant 0 : index
    %c0_77 = arith.constant 0 : index
    %75 = vector.load %arg9[%c0_76, %c0_77] : memref<1x16xf32, #tpu.memory_space<vmem>>, vector<1x16xf32>
    %76 = vector.broadcast %75 : vector<1x16xf32> to vector<256x16xf32>
    %77 = arith.addf %74, %76 : vector<256x16xf32>
    %c0_78 = arith.constant 0 : index
    %c0_79 = arith.constant 0 : index
    %78 = vector.load %arg6[%c0_78, %c0_79] : memref<8x16xf32, #tpu.memory_space<vmem>>, vector<8x16xf32>
    %cst_80 = arith.constant dense<0.000000e+00> : vector<256x16xf32>
    %79 = tpu.matmul %72, %78, %cst_80 {dimension_numbers = #tpu.dot_dimension_numbers<[1], [0], [0], [1], [0, 0, 1, 1], [], []>} : vector<256x8xf32>, vector<8x16xf32>, vector<256x16xf32> -> vector<256x16xf32>
    %c0_81 = arith.constant 0 : index
    %c0_82 = arith.constant 0 : index
    %80 = vector.load %arg7[%c0_81, %c0_82] : memref<1x16xf32, #tpu.memory_space<vmem>>, vector<1x16xf32>
    %81 = vector.broadcast %80 : vector<1x16xf32> to vector<256x16xf32>
    %82 = arith.addf %79, %81 : vector<256x16xf32>
    %83 = arith.addf %82, %77 : vector<256x16xf32>
    %cst_83 = arith.constant 0.000000e+00 : f32
    %84 = vector.broadcast %cst_83 : f32 to vector<256x16xf32>
    %85 = arith.maximumf %83, %84 : vector<256x16xf32>
    %c0_84 = arith.constant 0 : index
    %c0_85 = arith.constant 0 : index
    %c0_86 = arith.constant 0 : index
    %86 = vector.load %arg10[%c0_84, %c0_85, %c0_86] : memref<1x256x16xf32, #tpu.memory_space<vmem>>, vector<1x256x16xf32>
    %87 = vector.shape_cast %86 : vector<1x256x16xf32> to vector<256x16xf32>
    %88 = vector.shape_cast %85 : vector<256x16xf32> to vector<1x256x16xf32>
    tpu.vector_store %arg10[%c0_84, %c0_85, %c0_86], %88 {strides = array<i32>} : memref<1x256x16xf32, #tpu.memory_space<vmem>>, vector<1x256x16xf32>,
    return
  }
  func.func @transform_0(%arg0: i32) -> (i32, i32, i32) {
    %c0_i32 = arith.constant 0 : i32
    %c0_i32_0 = arith.constant 0 : i32
    %c0_i32_1 = arith.constant 0 : i32
    return %arg0, %c0_i32, %c0_i32_0 : i32, i32, i32
  }
  func.func @transform_1(%arg0: i32) -> (i32, i32) {
    %c0_i32 = arith.constant 0 : i32
    %c0_i32_0 = arith.constant 0 : i32
    %c0_i32_1 = arith.constant 0 : i32
    return %c0_i32, %c0_i32_0 : i32, i32
  }
  func.func @transform_2(%arg0: i32) -> (i32, i32) {
    %c0_i32 = arith.constant 0 : i32
    %c0_i32_0 = arith.constant 0 : i32
    %c0_i32_1 = arith.constant 0 : i32
    return %c0_i32, %c0_i32_0 : i32, i32
  }
  func.func @transform_3(%arg0: i32) -> (i32, i32, i32) {
    %c0_i32 = arith.constant 0 : i32
    %c0_i32_0 = arith.constant 0 : i32
    %c0_i32_1 = arith.constant 0 : i32
    %c0_i32_2 = arith.constant 0 : i32
    return %c0_i32, %c0_i32_0, %c0_i32_1 : i32, i32, i32
  }
  func.func @transform_4(%arg0: i32) -> (i32, i32) {
    %c0_i32 = arith.constant 0 : i32
    %c0_i32_0 = arith.constant 0 : i32
    %c0_i32_1 = arith.constant 0 : i32
    return %c0_i32, %c0_i32_0 : i32, i32
  }
  func.func @transform_5(%arg0: i32) -> (i32, i32) {
    %c0_i32 = arith.constant 0 : i32
    %c0_i32_0 = arith.constant 0 : i32
    %c0_i32_1 = arith.constant 0 : i32
    return %c0_i32, %c0_i32_0 : i32, i32
  }
  func.func @transform_6(%arg0: i32) -> (i32, i32) {
    %c0_i32 = arith.constant 0 : i32
    %c0_i32_0 = arith.constant 0 : i32
    %c0_i32_1 = arith.constant 0 : i32
    return %c0_i32, %c0_i32_0 : i32, i32
  }
  func.func @transform_7(%arg0: i32) -> (i32, i32) {
    %c0_i32 = arith.constant 0 : i32
    %c0_i32_0 = arith.constant 0 : i32
    %c0_i32_1 = arith.constant 0 : i32
    return %c0_i32, %c0_i32_0 : i32, i32
  }
  func.func @transform_8(%arg0: i32) -> (i32, i32) {
    %c0_i32 = arith.constant 0 : i32
    %c0_i32_0 = arith.constant 0 : i32
    %c0_i32_1 = arith.constant 0 : i32
    return %c0_i32, %c0_i32_0 : i32, i32
  }
  func.func @transform_9(%arg0: i32) -> (i32, i32, i32) {
    %c0_i32 = arith.constant 0 : i32
    %c0_i32_0 = arith.constant 0 : i32
    %c0_i32_1 = arith.constant 0 : i32
    return %arg0, %c0_i32, %c0_i32_0 : i32, i32, i32
  }
}

</mosaic_0001>

<bundles_post_ra>
// kernel: tpu_custom_call.1
= control target key start
LH: loop header
LB: loop body
LE: loop exit
PB: predicated region body
PF: predicated region fallthrough
CT: control target
= control target key end

     0   :  { %s6886_s30 = smov 0   ;;  %s8221_s0 = inlined_call_operand.vmem [shape: f32[2,256,4], index: 0, kind: input, shape index: {}]   ;;  %s8222_s1 = inlined_call_operand.vmem [shape: f32[4,8], index: 1, kind: input, shape index: {}]   ;;  %s8223_s2 = inlined_call_operand.vmem [shape: f32[1,8], index: 2, kind: input, shape index: {}]   ;;  %s8224_s3 = inlined_call_operand.vmem [shape: f32[9,8,8], index: 3, kind: input, shape index: {}]   ;;  %s8225_s4 = inlined_call_operand.vmem [shape: f32[1,8], index: 4, kind: input, shape index: {}]   ;;  %s8226_s5 = inlined_call_operand.vmem [shape: f32[8,16], index: 5, kind: input, shape index: {}]   ;;  %s8227_s6 = inlined_call_operand.vmem [shape: f32[1,16], index: 6, kind: input, shape index: {}]   ;;  %s8228_s7 = inlined_call_operand.vmem [shape: f32[4,16], index: 7, kind: input, shape index: {}]   ;;  %s8229_s8 = inlined_call_operand.vmem [shape: f32[1,16], index: 8, kind: input, shape index: {}]   ;;  %s8230_s9 = inlined_call_operand.vmem [shape: f32[2,256,16], index: 9, kind: output, shape index: {}]  }
   0x1 LB: > { %s5027_s10 = sadd.s32 4294967295, %s6833_s30   ;;  %p5031_p0 = scmp.ge.s32.totalorder %s6833_s30, 1  ;;  %s6833_s30 = sphi %s6886_s30, %s19_s30  }
   0x2   : > { %p287_p1 = scmp.lt.s32.totalorder %s6833_s30, 3 }
   0x4   : > { %p288_p2 = pnand %p5031_p0, %p287_p1 }
   0x6   : > { %291 = sbr.rel (%p288_p2) target bundleno = 1065 (0x429), region = 56 }
   0xd   : > { %v365_v0 = vld [vmem:[%s8222_s1] sm:$0xf]  ;;  %vm470_vm0 = vcmask 1043456   ;;  %p323_p3 = scmp.lt.s32.totalorder %s5027_s10, 1  ;;  %vm373_vm1 = vcmask 31744   ;;  %vm731_vm2 = vcmask 64512  }
   0xe   : > { %5834 = vmatprep.subr.msk.mxu0 %vm470_vm0, %v365_v0  ;;  %vm734_vm3 = vcmask 58368   ;;  %v6835_v33 = vmov 0.0   ;;  %v5070_v34 = vld [vmem:[%s8224_s3 + $0x8] sm:$0xff]  ;;  %v5168_v37 = vld [vmem:[%s8224_s3 + $0x18] sm:$0xff]  ;;  %v5201_v38 = vld [vmem:[%s8224_s3 + $0x20] sm:$0xff]  ;;  %vm4939_vm4 = vcmask 130048  }
   0xf   : > { %5835 = vmatpush3.msk.msra.mxu0 %vm470_vm0, %v365_v0  ;;  %s8309_s10 = smov (!%p323_p3, %s5027_s10), 1  ;;  %737 = vst.msk [vmem:[#allocation2 + $0x20] sm:$0xff] %vm731_vm2, %v6835_v33  ;;  %732 = vst.msk [vmem:[#allocation2] sm:$0xff] %vm731_vm2, %v6835_v33  ;;  %6034 = vmatprep.subr.mxu1 %v5168_v37  ;;  %v852_v39 = vld [vmem:[%s8224_s3] sm:$0xff]  ;;  %v7055_v54 = vld [vmem:[%s8224_s3 + $0x10] sm:$0xff] }
  0x10   : > { %s5436_s13 = sshll.u32 %s8309_s10, 8  ;;  %733 = vst.msk [vmem:[#allocation2 + $0x8] sm:$0xff] %vm731_vm2, %v6835_v33  ;;  %736 = vst.msk [vmem:[#allocation2 + $0x18] sm:$0xff] %vm731_vm2, %v6835_v33  ;;  %5884 = vmatprep.subr.mxu0 %v5070_v34  ;;  %6035 = vmatpush3.msra.mxu1 %v5168_v37  ;;  %v7044_v40 = vld [vmem:[%s8223_s2] ss:$0 sm:$0xff] }
  0x11   : > { %s6907_s16 = scalar_lea.vmem %s8221_s0, %s5436_s13  ;;  %739 = vst.msk [vmem:[#allocation2 + $0x30] sm:$0xff] %vm731_vm2, %v6835_v33  ;;  %740 = vst.msk [vmem:[#allocation2 + $0x38] sm:$0xff] %vm731_vm2, %v6835_v33  ;;  %6084 = vmatprep.subr.mxu1 %v5201_v38  ;;  %s8122_s12 = scalar_lea.vmem %s8230_s9, %s5436_s13 }
  0x12   : > { %v333_v1 = vld [vmem:[%s6907_s16] sm:$0xff]  ;;  %v334_v2 = vld [vmem:[%s6907_s16 + $0x8] sm:$0xff]  ;;  %v335_v3 = vld [vmem:[%s6907_s16 + $0x10] sm:$0xff]  ;;  %742 = vst.msk [vmem:[#allocation2 + $0x48] sm:$0xff] %vm731_vm2, %v6835_v33 }
  0x13   : > { %5836 = vmatprep.mubr.msk.f32.mxu0 %vm373_vm1, %v333_v1  ;;  %v336_v4 = vld [vmem:[%s6907_s16 + $0x18] sm:$0xff]  ;;  %v337_v5 = vld [vmem:[%s6907_s16 + $0x20] sm:$0xff]  ;;  %v338_v6 = vld [vmem:[%s6907_s16 + $0x28] sm:$0xff]  ;;  %743 = vst.msk [vmem:[#allocation2 + $0x50] sm:$0xff] %vm731_vm2, %v6835_v33 }
  0x14   : > { %5837 = vmatmul.mubr.msk.f32.vlgmr.msra.gmra.mrb[0].mxu0 %vm373_vm1, %v334_v2  ;;  %v339_v7 = vld [vmem:[%s6907_s16 + $0x30] sm:$0xff]  ;;  %v340_v8 = vld [vmem:[%s6907_s16 + $0x38] sm:$0xff]  ;;  %v341_v9 = vld [vmem:[%s6907_s16 + $0x40] sm:$0xff]  ;;  %745 = vst.msk [vmem:[#allocation2 + $0x60] sm:$0xff] %vm731_vm2, %v6835_v33 }
  0x15   : > { %5839 = vmatprep.mubr.msk.f32.mxu0 %vm373_vm1, %v335_v3  ;;  %v342_v10 = vld [vmem:[%s6907_s16 + $0x48] sm:$0xff]  ;;  %v343_v11 = vld [vmem:[%s6907_s16 + $0x50] sm:$0xff]  ;;  %v344_v12 = vld [vmem:[%s6907_s16 + $0x58] sm:$0xff]  ;;  %746 = vst.msk [vmem:[#allocation2 + $0x68] sm:$0xff] %vm731_vm2, %v6835_v33  ;;  %5885 = vmatpush3.msra.mxu0 %v5070_v34 }
  0x16   : > { %v345_v13 = vld [vmem:[%s6907_s16 + $0x60] sm:$0xff]  ;;  %v346_v14 = vld [vmem:[%s6907_s16 + $0x68] sm:$0xff]  ;;  %v347_v15 = vld [vmem:[%s6907_s16 + $0x70] sm:$0xff]  ;;  %748 = vst.msk [vmem:[#allocation2 + $0x78] sm:$0xff] %vm731_vm2, %v6835_v33  ;;  %5934 = vmatprep.subr.mxu0 %v852_v39 }
  0x17   : > { %v348_v16 = vld [vmem:[%s6907_s16 + $0x78] sm:$0xff]  ;;  %v349_v17 = vld [vmem:[%s6907_s16 + $0x80] sm:$0xff]  ;;  %v350_v18 = vld [vmem:[%s6907_s16 + $0x88] sm:$0xff]  ;;  %749 = vst.msk [vmem:[#allocation2 + $0x80] sm:$0xff] %vm731_vm2, %v6835_v33 }
  0x18   : > { %5840 = vmatmul.mubr.msk.f32.gmra.mrb[2].mxu0 %vm373_vm1, %v336_v4  ;;  %v351_v19 = vld [vmem:[%s6907_s16 + $0x90] sm:$0xff]  ;;  %v352_v20 = vld [vmem:[%s6907_s16 + $0x98] sm:$0xff]  ;;  %v353_v21 = vld [vmem:[%s6907_s16 + $0xa0] sm:$0xff]  ;;  %751 = vst.msk [vmem:[#allocation2 + $0x90] sm:$0xff] %vm731_vm2, %v6835_v33 }
  0x19   : > { %5842 = vmatprep.mubr.msk.f32.mxu0 %vm373_vm1, %v337_v5  ;;  %v354_v22 = vld [vmem:[%s6907_s16 + $0xa8] sm:$0xff]  ;;  %v355_v23 = vld [vmem:[%s6907_s16 + $0xb0] sm:$0xff]  ;;  %v356_v24 = vld [vmem:[%s6907_s16 + $0xb8] sm:$0xff]  ;;  %752 = vst.msk [vmem:[#allocation2 + $0x98] sm:$0xff] %vm731_vm2, %v6835_v33 }
  0x1a   : > { %v357_v25 = vld [vmem:[%s6907_s16 + $0xc0] sm:$0xff]  ;;  %v358_v26 = vld [vmem:[%s6907_s16 + $0xc8] sm:$0xff]  ;;  %v359_v27 = vld [vmem:[%s6907_s16 + $0xd0] sm:$0xff]  ;;  %754 = vst.msk [vmem:[#allocation2 + $0xa8] sm:$0xff] %vm731_vm2, %v6835_v33 }
  0x1b   : > { %v360_v28 = vld [vmem:[%s6907_s16 + $0xd8] sm:$0xff]  ;;  %v361_v29 = vld [vmem:[%s6907_s16 + $0xe0] sm:$0xff]  ;;  %v362_v30 = vld [vmem:[%s6907_s16 + $0xe8] sm:$0xff]  ;;  %755 = vst.msk [vmem:[#allocation2 + $0xb0] sm:$0xff] %vm731_vm2, %v6835_v33 }
  0x1c   : > { %5843 = vmatmul.mubr.msk.f32.gmra.mrb[4].mxu0 %vm373_vm1, %v338_v6  ;;  %v363_v31 = vld [vmem:[%s6907_s16 + $0xf0] sm:$0xff]  ;;  %v364_v32 = vld [vmem:[%s6907_s16 + $0xf8] sm:$0xff]  ;;  %757 = vst.msk [vmem:[#allocation2 + $0xc0] sm:$0xff] %vm731_vm2, %v6835_v33  ;;  %758 = vst.msk [vmem:[#allocation2 + $0xc8] sm:$0xff] %vm731_vm2, %v6835_v33 }
  0x1d   : > { %5845 = vmatprep.mubr.msk.f32.mxu0 %vm373_vm1, %v339_v7  ;;  %760 = vst.msk [vmem:[#allocation2 + $0xd8] sm:$0xff] %vm731_vm2, %v6835_v33  ;;  %761 = vst.msk [vmem:[#allocation2 + $0xe0] sm:$0xff] %vm731_vm2, %v6835_v33  ;;  %v853_v35 = vld [vmem:[#allocation2 + $0x1] sm:$0xff] }
  0x1e   : > { %763 = vst.msk [vmem:[#allocation2 + $0xf0] sm:$0xff] %vm731_vm2, %v6835_v33  ;;  %764 = vst.msk [vmem:[#allocation2 + $0xf8] sm:$0xff] %vm731_vm2, %v6835_v33  ;;  %v7081_v4 = vld [vmem:[%s8224_s3 + $0x28] sm:$0xff] }
  0x1f   : > { %766 = vst.msk [vmem:[#allocation2 + $0x108] sm:$0xff] %vm731_vm2, %v6835_v33  ;;  %767 = vst.msk [vmem:[#allocation2 + $0x110] sm:$0xff] %vm731_vm2, %v6835_v33 }
  0x20   : > { %5846 = vmatmul.mubr.msk.f32.gmra.mrb[6].mxu0 %vm373_vm1, %v340_v8  ;;  %769 = vst.msk [vmem:[#allocation2 + $0x120] sm:$0xff] %vm731_vm2, %v6835_v33  ;;  %770 = vst.msk [vmem:[#allocation2 + $0x128] sm:$0xff] %vm731_vm2, %v6835_v33 }
  0x21   : > { %5848 = vmatprep.mubr.msk.f32.mxu0 %vm373_vm1, %v341_v9  ;;  %772 = vst.msk [vmem:[#allocation2 + $0x138] sm:$0xff] %vm731_vm2, %v6835_v33  ;;  %773 = vst.msk [vmem:[#allocation2 + $0x140] sm:$0xff] %vm731_vm2, %v6835_v33 }
  0x22   : > { %775 = vst.msk [vmem:[#allocation2 + $0x150] sm:$0xff] %vm731_vm2, %v6835_v33  ;;  %776 = vst.msk [vmem:[#allocation2 + $0x158] sm:$0xff] %vm731_vm2, %v6835_v33 }
  0x23   : > { %778 = vst.msk [vmem:[#allocation2 + $0x168] sm:$0xff] %vm731_vm2, %v6835_v33  ;;  %779 = vst.msk [vmem:[#allocation2 + $0x170] sm:$0xff] %vm731_vm2, %v6835_v33 }
  0x24   : > { %5849 = vmatmul.mubr.msk.f32.gmra.mrb[8].mxu0 %vm373_vm1, %v342_v10  ;;  %781 = vst.msk [vmem:[#allocation2 + $0x180] sm:$0xff] %vm731_vm2, %v6835_v33  ;;  %782 = vst.msk [vmem:[#allocation2 + $0x188] sm:$0xff] %vm731_vm2, %v6835_v33 }
  0x25   : > { %5851 = vmatprep.mubr.msk.f32.mxu0 %vm373_vm1, %v343_v11  ;;  %784 = vst.msk [vmem:[#allocation2 + $0x198] sm:$0xff] %vm731_vm2, %v6835_v33  ;;  %785 = vst.msk [vmem:[#allocation2 + $0x1a0] sm:$0xff] %vm731_vm2, %v6835_v33 }
  0x26   : > { %738 = vst.msk [vmem:[#allocation2 + $0x28] sm:$0x3] %vm734_vm3, %v6835_v33  ;;  %735 = vst.msk [vmem:[#allocation2 + $0x10] sm:$0x3] %vm734_vm3, %v6835_v33 }
  0x27   : > { %741 = vst.msk [vmem:[#allocation2 + $0x40] sm:$0x3] %vm734_vm3, %v6835_v33  ;;  %744 = vst.msk [vmem:[#allocation2 + $0x58] sm:$0x3] %vm734_vm3, %v6835_v33 }
  0x28   : > { %5852 = vmatmul.mubr.msk.f32.gmra.mrb[10].mxu0 %vm373_vm1, %v344_v12  ;;  %747 = vst.msk [vmem:[#allocation2 + $0x70] sm:$0x3] %vm734_vm3, %v6835_v33  ;;  %750 = vst.msk [vmem:[#allocation2 + $0x88] sm:$0x3] %vm734_vm3, %v6835_v33 }
  0x29   : > { %5854 = vmatprep.mubr.msk.f32.mxu0 %vm373_vm1, %v345_v13  ;;  %753 = vst.msk [vmem:[#allocation2 + $0xa0] sm:$0x3] %vm734_vm3, %v6835_v33  ;;  %756 = vst.msk [vmem:[#allocation2 + $0xb8] sm:$0x3] %vm734_vm3, %v6835_v33 }
  0x2a   : > { %759 = vst.msk [vmem:[#allocation2 + $0xd0] sm:$0x3] %vm734_vm3, %v6835_v33  ;;  %762 = vst.msk [vmem:[#allocation2 + $0xe8] sm:$0x3] %vm734_vm3, %v6835_v33 }
  0x2b   : > { %765 = vst.msk [vmem:[#allocation2 + $0x100] sm:$0x3] %vm734_vm3, %v6835_v33  ;;  %768 = vst.msk [vmem:[#allocation2 + $0x118] sm:$0x3] %vm734_vm3, %v6835_v33 }
  0x2c   : > { %5855 = vmatmul.mubr.msk.f32.gmra.mrb[12].mxu0 %vm373_vm1, %v346_v14  ;;  %771 = vst.msk [vmem:[#allocation2 + $0x130] sm:$0x3] %vm734_vm3, %v6835_v33  ;;  %774 = vst.msk [vmem:[#allocation2 + $0x148] sm:$0x3] %vm734_vm3, %v6835_v33 }
  0x2d   : > { %5857 = vmatprep.mubr.msk.f32.mxu0 %vm373_vm1, %v347_v15  ;;  %777 = vst.msk [vmem:[#allocation2 + $0x160] sm:$0x3] %vm734_vm3, %v6835_v33  ;;  %780 = vst.msk [vmem:[#allocation2 + $0x178] sm:$0x3] %vm734_vm3, %v6835_v33  ;;  %v854_v36 = vld [vmem:[#allocation2 + $0x9] sm:$0xff] }
  0x2e   : > { %783 = vst.msk [vmem:[#allocation2 + $0x190] sm:$0x3] %vm734_vm3, %v6835_v33  ;;  %786 = vst.msk [vmem:[#allocation2 + $0x1a8] sm:$0x3] %vm734_vm3, %v6835_v33 }
  0x30   : > { %5858 = vmatmul.mubr.msk.f32.gmra.mrb[14].mxu0 %vm373_vm1, %v348_v16 }
  0x31   : > { %5860 = vmatprep.mubr.msk.f32.mxu0 %vm373_vm1, %v349_v17 }
  0x34   : > { %5861 = vmatmul.mubr.msk.f32.gmra.mrb[16].mxu0 %vm373_vm1, %v350_v18 }
  0x35   : > { %5863 = vmatprep.mubr.msk.f32.mxu0 %vm373_vm1, %v351_v19 }
  0x38   : > { %5864 = vmatmul.mubr.msk.f32.gmra.mrb[18].mxu0 %vm373_vm1, %v352_v20 }
  0x39   : > { %5866 = vmatprep.mubr.msk.f32.mxu0 %vm373_vm1, %v353_v21 }
  0x3c   : > { %5867 = vmatmul.mubr.msk.f32.gmra.mrb[20].mxu0 %vm373_vm1, %v354_v22 }
  0x3d   : > { %5869 = vmatprep.mubr.msk.f32.mxu0 %vm373_vm1, %v355_v23 }
  0x40   : > { %5870 = vmatmul.mubr.msk.f32.gmra.mrb[22].mxu0 %vm373_vm1, %v356_v24 }
  0x41   : > { %5872 = vmatprep.mubr.msk.f32.mxu0 %vm373_vm1, %v357_v25 }
  0x44   : > { %5873 = vmatmul.mubr.msk.f32.gmra.mrb[24].mxu0 %vm373_vm1, %v358_v26 }
  0x45   : > { %5875 = vmatprep.mubr.msk.f32.mxu0 %vm373_vm1, %v359_v27 }
  0x48   : > { %5876 = vmatmul.mubr.msk.f32.gmra.mrb[26].mxu0 %vm373_vm1, %v360_v28 }
  0x49   : > { %5878 = vmatprep.mubr.msk.f32.mxu0 %vm373_vm1, %v361_v29 }
  0x4c   : > { %5879 = vmatmul.mubr.msk.f32.gmra.mrb[28].mxu0 %vm373_vm1, %v362_v30 }
  0x4d   : > { %5881 = vmatprep.mubr.msk.f32.mxu0 %vm373_vm1, %v363_v31 }
  0x50   : > { %5882 = vmatmul.mubr.msk.f32.gmra.mrb[30].mxu0 %vm373_vm1, %v364_v32 }
  0x51   : > { %5886 = vmatprep.mubr.msk.f32.mxu0 %vm731_vm2, %v853_v35 }
  0x54   : > { %5887 = vmatmul.mubr.msk.f32.vlgmr.msra.gmra.mrb[32].mxu0 %vm731_vm2, %v854_v36 }
  0x55   : > { %5935 = vmatpush3.msra.mxu0 %v852_v39 }
  0x56   : > { %5984 = vmatprep.subr.mxu0 %v7055_v54 }
  0xe7   : > { %v5838_v41 = vpop.f32.mrb[0].mxu0 }
  0xe8   : > { %v546_v42 = vadd.f32 %v5838_v41, %v7044_v40  ;;  %v540_v43 = vpop.f32.mrb[1].mxu0 }
  0xe9   : > { %v541_v44 = vadd.f32 %v7044_v40, %v540_v43 }
  0xea   : > { %v700_v45 = vmax.f32 %v546_v42, 0.0 }
  0xeb   : > { %v699_v46 = vmax.f32 %v541_v44, 0.0  ;;  %v5841_v47 = vpop.f32.mrb[2].mxu0 }
  0xec   : > { %789 = vst.msk [vmem:[#allocation2 + $0x21] sm:$0xff] %vm731_vm2, %v700_v45  ;;  %v556_v48 = vadd.f32 %v5841_v47, %v7044_v40  ;;  %v550_v49 = vpop.f32.mrb[3].mxu0 }
  0xed   : > { %788 = vst.msk [vmem:[#allocation2 + $0x19] sm:$0xff] %vm731_vm2, %v699_v46  ;;  %v551_v50 = vadd.f32 %v7044_v40, %v550_v49 }
  0xee   : > { %v702_v51 = vmax.f32 %v556_v48, 0.0 }
  0xef   : > { %v701_v52 = vmax.f32 %v551_v50, 0.0  ;;  %v5844_v53 = vpop.f32.mrb[4].mxu0 }
  0xf0   : > { %791 = vst.msk [vmem:[#allocation2 + $0x39] sm:$0xff] %vm731_vm2, %v702_v51  ;;  %v566_v55 = vadd.f32 %v5844_v53, %v7044_v40  ;;  %v560_v56 = vpop.f32.mrb[5].mxu0 }
  0xf1   : > { %790 = vst.msk [vmem:[#allocation2 + $0x31] sm:$0xff] %vm731_vm2, %v701_v52  ;;  %v561_v57 = vadd.f32 %v7044_v40, %v560_v56 }
  0xf2   : > { %v704_v58 = vmax.f32 %v566_v55, 0.0 }
  0xf3   : > { %v703_v59 = vmax.f32 %v561_v57, 0.0  ;;  %v5847_v60 = vpop.f32.mrb[6].mxu0  ;;  %v7076_v3 = vld [vmem:[#allocation2 + $0x21] sm:$0xff] }
  0xf4   : > { %793 = vst.msk [vmem:[#allocation2 + $0x51] sm:$0xff] %vm731_vm2, %v704_v58  ;;  %v576_v61 = vadd.f32 %v5847_v60, %v7044_v40  ;;  %v570_v62 = vpop.f32.mrb[7].mxu0  ;;  %v7064_v63 = vld [vmem:[#allocation2 + $0x19] sm:$0xff] }
  0xf5   : > { %v7066_v0 = vld [vmem:[#allocation2 + $0x18] sm:$0xff]  ;;  %v7068_v1 = vld [vmem:[#allocation2 + $0x20] sm:$0xff]  ;;  %792 = vst.msk [vmem:[#allocation2 + $0x49] sm:$0xff] %vm731_vm2, %v703_v59  ;;  %v571_v2 = vadd.f32 %v7044_v40, %v570_v62  ;;  %5889 = vmatprep.mubr.msk.f32.mxu0 %vm731_vm2, %v7064_v63 }
  0xf6   : > { %6036 = vmatprep.mubr.msk.f32.mxu1 %vm731_vm2, %v7066_v0  ;;  %v706_v5 = vmax.f32 %v576_v61, 0.0  ;;  %5890 = vmatmul.mubr.msk.f32.gmra.mrb[34].mxu0 %vm731_vm2, %v7076_v3 }
  0xf7   : > { %6037 = vmatmul.mubr.msk.f32.vlgmr.msra.gmra.mrb[0].mxu1 %vm731_vm2, %v7068_v1  ;;  %v705_v6 = vmax.f32 %v571_v2, 0.0  ;;  %v5850_v7 = vpop.f32.mrb[8].mxu0  ;;  %v7102_v14 = vld [vmem:[#allocation2 + $0x39] sm:$0xff] }
  0xf8   : > { %6085 = vmatpush3.msra.mxu1 %v5201_v38  ;;  %795 = vst.msk [vmem:[#allocation2 + $0x69] sm:$0xff] %vm731_vm2, %v706_v5  ;;  %v586_v8 = vadd.f32 %v5850_v7, %v7044_v40  ;;  %v580_v9 = vpop.f32.mrb[9].mxu0  ;;  %v7089_v10 = vld [vmem:[#allocation2 + $0x31] sm:$0xff] }
  0xf9   : > { %v7091_v11 = vld [vmem:[#allocation2 + $0x30] sm:$0xff]  ;;  %v7093_v12 = vld [vmem:[#allocation2 + $0x38] sm:$0xff]  ;;  %6134 = vmatprep.subr.mxu1 %v7081_v4  ;;  %794 = vst.msk [vmem:[#allocation2 + $0x61] sm:$0xff] %vm731_vm2, %v705_v6  ;;  %v581_v13 = vadd.f32 %v7044_v40, %v580_v9  ;;  %5892 = vmatprep.mubr.msk.f32.mxu0 %vm731_vm2, %v7089_v10 }
  0xfa   : > { %6039 = vmatprep.mubr.msk.f32.mxu1 %vm731_vm2, %v7091_v11  ;;  %v708_v15 = vmax.f32 %v586_v8, 0.0  ;;  %5893 = vmatmul.mubr.msk.f32.gmra.mrb[36].mxu0 %vm731_vm2, %v7102_v14 }
  0xfb   : > { %6040 = vmatmul.mubr.msk.f32.gmra.mrb[2].mxu1 %vm731_vm2, %v7093_v12  ;;  %v707_v16 = vmax.f32 %v581_v13, 0.0  ;;  %v5853_v17 = vpop.f32.mrb[10].mxu0  ;;  %v7122_v24 = vld [vmem:[#allocation2 + $0x51] sm:$0xff] }
  0xfc   : > { %797 = vst.msk [vmem:[#allocation2 + $0x81] sm:$0xff] %vm731_vm2, %v708_v15  ;;  %v596_v18 = vadd.f32 %v5853_v17, %v7044_v40  ;;  %v590_v19 = vpop.f32.mrb[11].mxu0  ;;  %v7110_v20 = vld [vmem:[#allocation2 + $0x49] sm:$0xff] }
  0xfd   : > { %v7112_v21 = vld [vmem:[#allocation2 + $0x48] sm:$0xff]  ;;  %v7114_v22 = vld [vmem:[#allocation2 + $0x50] sm:$0xff]  ;;  %796 = vst.msk [vmem:[#allocation2 + $0x79] sm:$0xff] %vm731_vm2, %v707_v16  ;;  %v591_v23 = vadd.f32 %v7044_v40, %v590_v19  ;;  %5895 = vmatprep.mubr.msk.f32.mxu0 %vm731_vm2, %v7110_v20 }
  0xfe   : > { %6042 = vmatprep.mubr.msk.f32.mxu1 %vm731_vm2, %v7112_v21  ;;  %v710_v25 = vmax.f32 %v596_v18, 0.0  ;;  %5896 = vmatmul.mubr.msk.f32.gmra.mrb[38].mxu0 %vm731_vm2, %v7122_v24 }
  0xff   : > { %6043 = vmatmul.mubr.msk.f32.gmra.mrb[4].mxu1 %vm731_vm2, %v7114_v22  ;;  %v709_v26 = vmax.f32 %v591_v23, 0.0  ;;  %v5856_v27 = vpop.f32.mrb[12].mxu0  ;;  %v7142_v34 = vld [vmem:[#allocation2 + $0x69] sm:$0xff] }
 0x100   : > { %799 = vst.msk [vmem:[#allocation2 + $0x99] sm:$0xff] %vm731_vm2, %v710_v25  ;;  %v606_v28 = vadd.f32 %v5856_v27, %v7044_v40  ;;  %v600_v29 = vpop.f32.mrb[13].mxu0  ;;  %v7130_v30 = vld [vmem:[#allocation2 + $0x61] sm:$0xff] }
 0x101   : > { %v7132_v31 = vld [vmem:[#allocation2 + $0x60] sm:$0xff]  ;;  %v7134_v32 = vld [vmem:[#allocation2 + $0x68] sm:$0xff]  ;;  %798 = vst.msk [vmem:[#allocation2 + $0x91] sm:$0xff] %vm731_vm2, %v709_v26  ;;  %v601_v33 = vadd.f32 %v7044_v40, %v600_v29  ;;  %5898 = vmatprep.mubr.msk.f32.mxu0 %vm731_vm2, %v7130_v30 }
 0x102   : > { %6045 = vmatprep.mubr.msk.f32.mxu1 %vm731_vm2, %v7132_v31  ;;  %v712_v35 = vmax.f32 %v606_v28, 0.0  ;;  %5899 = vmatmul.mubr.msk.f32.gmra.mrb[40].mxu0 %vm731_vm2, %v7142_v34 }
 0x103   : > { %6046 = vmatmul.mubr.msk.f32.gmra.mrb[6].mxu1 %vm731_vm2, %v7134_v32  ;;  %v711_v36 = vmax.f32 %v601_v33, 0.0  ;;  %v5859_v37 = vpop.f32.mrb[14].mxu0  ;;  %v7162_v45 = vld [vmem:[#allocation2 + $0x81] sm:$0xff] }
 0x104   : > { %801 = vst.msk [vmem:[#allocation2 + $0xb1] sm:$0xff] %vm731_vm2, %v712_v35  ;;  %v616_v38 = vadd.f32 %v5859_v37, %v7044_v40  ;;  %v610_v39 = vpop.f32.mrb[15].mxu0  ;;  %v7150_v41 = vld [vmem:[#allocation2 + $0x79] sm:$0xff] }
 0x105   : > { %v7152_v42 = vld [vmem:[#allocation2 + $0x78] sm:$0xff]  ;;  %v7154_v43 = vld [vmem:[#allocation2 + $0x80] sm:$0xff]  ;;  %800 = vst.msk [vmem:[#allocation2 + $0xa9] sm:$0xff] %vm731_vm2, %v711_v36  ;;  %v611_v44 = vadd.f32 %v7044_v40, %v610_v39  ;;  %5901 = vmatprep.mubr.msk.f32.mxu0 %vm731_vm2, %v7150_v41 }
 0x106   : > { %6048 = vmatprep.mubr.msk.f32.mxu1 %vm731_vm2, %v7152_v42  ;;  %v714_v46 = vmax.f32 %v616_v38, 0.0  ;;  %5902 = vmatmul.mubr.msk.f32.gmra.mrb[42].mxu0 %vm731_vm2, %v7162_v45 }
 0x107   : > { %6049 = vmatmul.mubr.msk.f32.gmra.mrb[8].mxu1 %vm731_vm2, %v7154_v43  ;;  %v713_v47 = vmax.f32 %v611_v44, 0.0  ;;  %v5862_v48 = vpop.f32.mrb[16].mxu0  ;;  %v7182_v56 = vld [vmem:[#allocation2 + $0x99] sm:$0xff] }
 0x108   : > { %803 = vst.msk [vmem:[#allocation2 + $0xc9] sm:$0xff] %vm731_vm2, %v714_v46  ;;  %v626_v49 = vadd.f32 %v5862_v48, %v7044_v40  ;;  %v620_v50 = vpop.f32.mrb[17].mxu0  ;;  %v7170_v51 = vld [vmem:[#allocation2 + $0x91] sm:$0xff] }
 0x109   : > { %v7172_v52 = vld [vmem:[#allocation2 + $0x90] sm:$0xff]  ;;  %v7174_v53 = vld [vmem:[#allocation2 + $0x98] sm:$0xff]  ;;  %802 = vst.msk [vmem:[#allocation2 + $0xc1] sm:$0xff] %vm731_vm2, %v713_v47  ;;  %v621_v55 = vadd.f32 %v7044_v40, %v620_v50  ;;  %5904 = vmatprep.mubr.msk.f32.mxu0 %vm731_vm2, %v7170_v51 }
 0x10a   : > { %6051 = vmatprep.mubr.msk.f32.mxu1 %vm731_vm2, %v7172_v52  ;;  %v716_v57 = vmax.f32 %v626_v49, 0.0  ;;  %5905 = vmatmul.mubr.msk.f32.gmra.mrb[44].mxu0 %vm731_vm2, %v7182_v56 }
 0x10b   : > { %6052 = vmatmul.mubr.msk.f32.gmra.mrb[10].mxu1 %vm731_vm2, %v7174_v53  ;;  %v715_v58 = vmax.f32 %v621_v55, 0.0  ;;  %v5865_v59 = vpop.f32.mrb[18].mxu0  ;;  %v7202_v7 = vld [vmem:[#allocation2 + $0xb1] sm:$0xff] }
 0x10c   : > { %805 = vst.msk [vmem:[#allocation2 + $0xe1] sm:$0xff] %vm731_vm2, %v716_v57  ;;  %v636_v60 = vadd.f32 %v5865_v59, %v7044_v40  ;;  %v630_v61 = vpop.f32.mrb[19].mxu0  ;;  %v7190_v62 = vld [vmem:[#allocation2 + $0xa9] sm:$0xff] }
 0x10d   : > { %v7192_v2 = vld [vmem:[#allocation2 + $0xa8] sm:$0xff]  ;;  %v7194_v5 = vld [vmem:[#allocation2 + $0xb0] sm:$0xff]  ;;  %804 = vst.msk [vmem:[#allocation2 + $0xd9] sm:$0xff] %vm731_vm2, %v715_v58  ;;  %v631_v6 = vadd.f32 %v7044_v40, %v630_v61  ;;  %5907 = vmatprep.mubr.msk.f32.mxu0 %vm731_vm2, %v7190_v62 }
 0x10e   : > { %6054 = vmatprep.mubr.msk.f32.mxu1 %vm731_vm2, %v7192_v2  ;;  %v718_v8 = vmax.f32 %v636_v60, 0.0  ;;  %5908 = vmatmul.mubr.msk.f32.gmra.mrb[46].mxu0 %vm731_vm2, %v7202_v7 }
 0x10f   : > { %6055 = vmatmul.mubr.msk.f32.gmra.mrb[12].mxu1 %vm731_vm2, %v7194_v5  ;;  %v717_v9 = vmax.f32 %v631_v6, 0.0  ;;  %v5868_v13 = vpop.f32.mrb[20].mxu0  ;;  %v7222_v25 = vld [vmem:[#allocation2 + $0xc9] sm:$0xff] }
 0x110   : > { %807 = vst.msk [vmem:[#allocation2 + $0xf9] sm:$0xff] %vm731_vm2, %v718_v8  ;;  %v646_v15 = vadd.f32 %v5868_v13, %v7044_v40  ;;  %v640_v16 = vpop.f32.mrb[21].mxu0  ;;  %v7210_v17 = vld [vmem:[#allocation2 + $0xc1] sm:$0xff] }
 0x111   : > { %v7212_v18 = vld [vmem:[#allocation2 + $0xc0] sm:$0xff]  ;;  %v7214_v19 = vld [vmem:[#allocation2 + $0xc8] sm:$0xff]  ;;  %806 = vst.msk [vmem:[#allocation2 + $0xf1] sm:$0xff] %vm731_vm2, %v717_v9  ;;  %v641_v23 = vadd.f32 %v7044_v40, %v640_v16  ;;  %5910 = vmatprep.mubr.msk.f32.mxu0 %vm731_vm2, %v7210_v17 }
 0x112   : > { %6057 = vmatprep.mubr.msk.f32.mxu1 %vm731_vm2, %v7212_v18  ;;  %v720_v26 = vmax.f32 %v646_v15, 0.0  ;;  %5911 = vmatmul.mubr.msk.f32.gmra.mrb[48].mxu0 %vm731_vm2, %v7222_v25 }
 0x113   : > { %6058 = vmatmul.mubr.msk.f32.gmra.mrb[14].mxu1 %vm731_vm2, %v7214_v19  ;;  %v719_v27 = vmax.f32 %v641_v23, 0.0  ;;  %v5871_v28 = vpop.f32.mrb[22].mxu0  ;;  %v7242_v39 = vld [vmem:[#allocation2 + $0xe1] sm:$0xff] }
 0x114   : > { %809 = vst.msk [vmem:[#allocation2 + $0x111] sm:$0xff] %vm731_vm2, %v720_v26  ;;  %v656_v29 = vadd.f32 %v5871_v28, %v7044_v40  ;;  %v650_v33 = vpop.f32.mrb[23].mxu0  ;;  %v7230_v35 = vld [vmem:[#allocation2 + $0xd9] sm:$0xff] }
 0x115   : > { %v7232_v36 = vld [vmem:[#allocation2 + $0xd8] sm:$0xff]  ;;  %v7234_v37 = vld [vmem:[#allocation2 + $0xe0] sm:$0xff]  ;;  %808 = vst.msk [vmem:[#allocation2 + $0x109] sm:$0xff] %vm731_vm2, %v719_v27  ;;  %v651_v38 = vadd.f32 %v7044_v40, %v650_v33  ;;  %5913 = vmatprep.mubr.msk.f32.mxu0 %vm731_vm2, %v7230_v35 }
 0x116   : > { %6060 = vmatprep.mubr.msk.f32.mxu1 %vm731_vm2, %v7232_v36  ;;  %v722_v44 = vmax.f32 %v656_v29, 0.0  ;;  %5914 = vmatmul.mubr.msk.f32.gmra.mrb[50].mxu0 %vm731_vm2, %v7242_v39 }
 0x117   : > { %6061 = vmatmul.mubr.msk.f32.gmra.mrb[16].mxu1 %vm731_vm2, %v7234_v37  ;;  %v721_v46 = vmax.f32 %v651_v38, 0.0  ;;  %v5874_v47 = vpop.f32.mrb[24].mxu0  ;;  %v7262_v59 = vld [vmem:[#allocation2 + $0xf9] sm:$0xff] }
 0x118   : > { %811 = vst.msk [vmem:[#allocation2 + $0x129] sm:$0xff] %vm731_vm2, %v722_v44  ;;  %v666_v48 = vadd.f32 %v5874_v47, %v7044_v40  ;;  %v660_v49 = vpop.f32.mrb[25].mxu0  ;;  %v7250_v50 = vld [vmem:[#allocation2 + $0xf1] sm:$0xff] }
 0x119   : > { %v7252_v55 = vld [vmem:[#allocation2 + $0xf0] sm:$0xff]  ;;  %v7254_v57 = vld [vmem:[#allocation2 + $0xf8] sm:$0xff]  ;;  %810 = vst.msk [vmem:[#allocation2 + $0x121] sm:$0xff] %vm731_vm2, %v721_v46  ;;  %v661_v58 = vadd.f32 %v7044_v40, %v660_v49  ;;  %5916 = vmatprep.mubr.msk.f32.mxu0 %vm731_vm2, %v7250_v50 }
 0x11a   : > { %6063 = vmatprep.mubr.msk.f32.mxu1 %vm731_vm2, %v7252_v55  ;;  %v724_v60 = vmax.f32 %v666_v48, 0.0  ;;  %5917 = vmatmul.mubr.msk.f32.gmra.mrb[52].mxu0 %vm731_vm2, %v7262_v59 }
 0x11b   : > { %6064 = vmatmul.mubr.msk.f32.gmra.mrb[18].mxu1 %vm731_vm2, %v7254_v57  ;;  %v723_v61 = vmax.f32 %v661_v58, 0.0  ;;  %v5877_v6 = vpop.f32.mrb[26].mxu0  ;;  %v7282_v26 = vld [vmem:[#allocation2 + $0x111] sm:$0xff] }
 0x11c   : > { %813 = vst.msk [vmem:[#allocation2 + $0x141] sm:$0xff] %vm731_vm2, %v724_v60  ;;  %v676_v8 = vadd.f32 %v5877_v6, %v7044_v40  ;;  %v670_v9 = vpop.f32.mrb[27].mxu0  ;;  %v7270_v13 = vld [vmem:[#allocation2 + $0x109] sm:$0xff] }
 0x11d   : > { %v7272_v15 = vld [vmem:[#allocation2 + $0x108] sm:$0xff]  ;;  %v7274_v16 = vld [vmem:[#allocation2 + $0x110] sm:$0xff]  ;;  %812 = vst.msk [vmem:[#allocation2 + $0x139] sm:$0xff] %vm731_vm2, %v723_v61  ;;  %v671_v23 = vadd.f32 %v7044_v40, %v670_v9  ;;  %5919 = vmatprep.mubr.msk.f32.mxu0 %vm731_vm2, %v7270_v13 }
 0x11e   : > { %6066 = vmatprep.mubr.msk.f32.mxu1 %vm731_vm2, %v7272_v15  ;;  %v726_v27 = vmax.f32 %v676_v8, 0.0  ;;  %5920 = vmatmul.mubr.msk.f32.gmra.mrb[54].mxu0 %vm731_vm2, %v7282_v26 }
 0x11f   : > { %6067 = vmatmul.mubr.msk.f32.gmra.mrb[20].mxu1 %vm731_vm2, %v7274_v16  ;;  %v725_v28 = vmax.f32 %v671_v23, 0.0  ;;  %v5880_v29 = vpop.f32.mrb[28].mxu0  ;;  %v7302_v49 = vld [vmem:[#allocation2 + $0x129] sm:$0xff] }
 0x120   : > { %815 = vst.msk [vmem:[#allocation2 + $0x159] sm:$0xff] %vm731_vm2, %v726_v27  ;;  %v686_v33 = vadd.f32 %v5880_v29, %v7044_v40  ;;  %v680_v38 = vpop.f32.mrb[29].mxu0  ;;  %v7290_v44 = vld [vmem:[#allocation2 + $0x121] sm:$0xff] }
 0x121   : > { %v7292_v46 = vld [vmem:[#allocation2 + $0x120] sm:$0xff]  ;;  %v7294_v47 = vld [vmem:[#allocation2 + $0x128] sm:$0xff]  ;;  %814 = vst.msk [vmem:[#allocation2 + $0x151] sm:$0xff] %vm731_vm2, %v725_v28  ;;  %v681_v48 = vadd.f32 %v7044_v40, %v680_v38  ;;  %5922 = vmatprep.mubr.msk.f32.mxu0 %vm731_vm2, %v7290_v44 }
 0x122   : > { %6069 = vmatprep.mubr.msk.f32.mxu1 %vm731_vm2, %v7292_v46  ;;  %v728_v58 = vmax.f32 %v686_v33, 0.0  ;;  %5923 = vmatmul.mubr.msk.f32.gmra.mrb[56].mxu0 %vm731_vm2, %v7302_v49 }
 0x123   : > { %6070 = vmatmul.mubr.msk.f32.gmra.mrb[22].mxu1 %vm731_vm2, %v7294_v47  ;;  %v727_v60 = vmax.f32 %v681_v48, 0.0  ;;  %v5883_v61 = vpop.f32.mrb[30].mxu0  ;;  %v7322_v29 = vld [vmem:[#allocation2 + $0x141] sm:$0xff] }
 0x124   : > { %817 = vst.msk [vmem:[#allocation2 + $0x171] sm:$0xff] %vm731_vm2, %v728_v58  ;;  %v696_v6 = vadd.f32 %v5883_v61, %v7044_v40  ;;  %v690_v8 = vpop.f32.mrb[31].mxu0  ;;  %v7310_v9 = vld [vmem:[#allocation2 + $0x139] sm:$0xff] }
 0x125   : > { %v7312_v23 = vld [vmem:[#allocation2 + $0x138] sm:$0xff]  ;;  %v7314_v27 = vld [vmem:[#allocation2 + $0x140] sm:$0xff]  ;;  %816 = vst.msk [vmem:[#allocation2 + $0x169] sm:$0xff] %vm731_vm2, %v727_v60  ;;  %v691_v28 = vadd.f32 %v7044_v40, %v690_v8  ;;  %5925 = vmatprep.mubr.msk.f32.mxu0 %vm731_vm2, %v7310_v9 }
 0x126   : > { %6072 = vmatprep.mubr.msk.f32.mxu1 %vm731_vm2, %v7312_v23  ;;  %v730_v33 = vmax.f32 %v696_v6, 0.0  ;;  %5926 = vmatmul.mubr.msk.f32.gmra.mrb[58].mxu0 %vm731_vm2, %v7322_v29  ;;  %v820_v61 = vld [vmem:[#allocation2] sm:$0xff] }
 0x127   : > { %6073 = vmatmul.mubr.msk.f32.gmra.mrb[24].mxu1 %vm731_vm2, %v7314_v27  ;;  %v729_v38 = vmax.f32 %v691_v28, 0.0  ;;  %v7340_v60 = vld [vmem:[#allocation2 + $0x159] sm:$0xff] }
 0x128   : > { %819 = vst.msk [vmem:[#allocation2 + $0x189] sm:$0xff] %vm731_vm2, %v730_v33  ;;  %v7329_v48 = vld [vmem:[#allocation2 + $0x151] sm:$0xff]  ;;  %8259 = vst [vmem:[#allocation4_spill] sm:$0xff] %v7340_v60 }
 0x129   : > { %v7331_v40 = vld [vmem:[#allocation2 + $0x150] sm:$0xff]  ;;  %v7333_v58 = vld [vmem:[#allocation2 + $0x158] sm:$0xff]  ;;  %818 = vst.msk [vmem:[#allocation2 + $0x181] sm:$0xff] %vm731_vm2, %v729_v38  ;;  %5928 = vmatprep.mubr.msk.f32.mxu0 %vm731_vm2, %v7329_v48  ;;  %v821_v38 = vld [vmem:[#allocation2 + $0x8] sm:$0xff] }
 0x12a   : > { %8258 = vst [vmem:[#allocation3_spill] sm:$0xff] %v7333_v58  ;;  %6075 = vmatprep.mubr.msk.f32.mxu1 %vm731_vm2, %v7331_v40  ;;  %5929 = vmatmul.mubr.msk.f32.gmra.mrb[60].mxu0 %vm731_vm2, %v7340_v60 }
 0x12b   : > { %6076 = vmatmul.mubr.msk.f32.gmra.mrb[26].mxu1 %vm731_vm2, %v7333_v58  ;;  %v7356_v33 = vld [vmem:[#allocation2 + $0x171] sm:$0xff] }
 0x12c   : > { %v7346_v6 = vld [vmem:[#allocation2 + $0x169] sm:$0xff] }
 0x12d   : > { %v7348_v8 = vld [vmem:[#allocation2 + $0x168] sm:$0xff]  ;;  %v7350_v28 = vld [vmem:[#allocation2 + $0x170] sm:$0xff]  ;;  %5931 = vmatprep.mubr.msk.f32.mxu0 %vm731_vm2, %v7346_v6 }
 0x12e   : > { %6078 = vmatprep.mubr.msk.f32.mxu1 %vm731_vm2, %v7348_v8  ;;  %5932 = vmatmul.mubr.msk.f32.gmra.mrb[62].mxu0 %vm731_vm2, %v7356_v33 }
 0x12f   : > { %6079 = vmatmul.mubr.msk.f32.gmra.mrb[28].mxu1 %vm731_vm2, %v7350_v28  ;;  %5936 = vmatprep.mubr.msk.f32.mxu0 %vm731_vm2, %v820_v61  ;;  %v7380_v61 = vld [vmem:[%s8224_s3 + $0x30] sm:$0xff] }
 0x130   : > { %v7363_v60 = vld [vmem:[#allocation2 + $0x180] sm:$0xff]  ;;  %v7365_v58 = vld [vmem:[#allocation2 + $0x188] sm:$0xff] }
 0x131   : > { %6081 = vmatprep.mubr.msk.f32.mxu1 %vm731_vm2, %v7363_v60 }
 0x132   : > { %5937 = vmatmul.mubr.msk.f32.vlgmr.msra.gmra.mrb[32].mxu0 %vm731_vm2, %v821_v38  ;;  %v7539_v38 = vld [vmem:[#allocation2 + $0x52] sm:$0xff] }
 0x133   : > { %6082 = vmatmul.mubr.msk.f32.gmra.mrb[30].mxu1 %vm731_vm2, %v7365_v58  ;;  %5939 = vmatprep.mubr.msk.f32.mxu0 %vm731_vm2, %v7066_v0  ;;  %v1529_v0 = vld [vmem:[#allocation2 + $0x2] sm:$0xff] }
 0x134   : > { %6086 = vmatprep.mubr.msk.f32.mxu1 %vm731_vm2, %v7064_v63  ;;  %5985 = vmatpush3.msra.mxu0 %v7055_v54  ;;  %v8260_v54 = vld [vmem:[#allocation3_spill] sm:$0xff]  ;;  %v8261_v63 = vld [vmem:[#allocation4_spill] sm:$0xff] }
 0x136   : > { %5940 = vmatmul.mubr.msk.f32.gmra.mrb[34].mxu0 %vm731_vm2, %v7068_v1  ;;  %v7500_v1 = vld [vmem:[#allocation2 + $0x181] sm:$0xff] }
 0x137   : > { %6087 = vmatmul.mubr.msk.f32.vlgmr.msra.gmra.mrb[0].mxu1 %vm731_vm2, %v7076_v3  ;;  %5942 = vmatprep.mubr.msk.f32.mxu0 %vm731_vm2, %v7091_v11  ;;  %v1530_v3 = vld [vmem:[#allocation2 + $0xa] sm:$0xff] }
 0x138   : > { %6135 = vmatpush3.msra.mxu1 %v7081_v4  ;;  %6089 = vmatprep.mubr.msk.f32.mxu1 %vm731_vm2, %v7089_v10  ;;  %v7505_v4 = vld [vmem:[#allocation2 + $0x189] sm:$0xff]  ;;  %v1531_v10 = vld [vmem:[#allocation2 + $0x1a] sm:$0xff] }
 0x139   : > { %6184 = vmatprep.subr.mxu1 %v7380_v61 }
 0x13a   : > { %5943 = vmatmul.mubr.msk.f32.gmra.mrb[36].mxu0 %vm731_vm2, %v7093_v12 }
 0x13b   : > { %6090 = vmatmul.mubr.msk.f32.gmra.mrb[2].mxu1 %vm731_vm2, %v7102_v14  ;;  %5945 = vmatprep.mubr.msk.f32.mxu0 %vm731_vm2, %v7112_v21  ;;  %v1532_v14 = vld [vmem:[#allocation2 + $0x22] sm:$0xff] }
 0x13c   : > { %6092 = vmatprep.mubr.msk.f32.mxu1 %vm731_vm2, %v7110_v20  ;;  %v7515_v20 = vld [vmem:[%s8224_s3 + $0x38] sm:$0xff] }
 0x13e   : > { %5946 = vmatmul.mubr.msk.f32.gmra.mrb[38].mxu0 %vm731_vm2, %v7114_v22 }
 0x13f   : > { %6093 = vmatmul.mubr.msk.f32.gmra.mrb[4].mxu1 %vm731_vm2, %v7122_v24  ;;  %5948 = vmatprep.mubr.msk.f32.mxu0 %vm731_vm2, %v7132_v31  ;;  %v7519_v24 = vld [vmem:[#allocation2 + $0x32] sm:$0xff] }
 0x140   : > { %6095 = vmatprep.mubr.msk.f32.mxu1 %vm731_vm2, %v7130_v30  ;;  %v7527_v30 = vld [vmem:[#allocation2 + $0x3a] sm:$0xff] }
 0x142   : > { %5949 = vmatmul.mubr.msk.f32.gmra.mrb[40].mxu0 %vm731_vm2, %v7134_v32 }
 0x143   : > { %6096 = vmatmul.mubr.msk.f32.gmra.mrb[6].mxu1 %vm731_vm2, %v7142_v34  ;;  %5951 = vmatprep.mubr.msk.f32.mxu0 %vm731_vm2, %v7152_v42  ;;  %v7533_v34 = vld [vmem:[#allocation2 + $0x4a] sm:$0xff] }
 0x144   : > { %6098 = vmatprep.mubr.msk.f32.mxu1 %vm731_vm2, %v7150_v41 }
 0x146   : > { %5952 = vmatmul.mubr.msk.f32.gmra.mrb[42].mxu0 %vm731_vm2, %v7154_v43 }
 0x147   : > { %6099 = vmatmul.mubr.msk.f32.gmra.mrb[8].mxu1 %vm731_vm2, %v7162_v45  ;;  %5954 = vmatprep.mubr.msk.f32.mxu0 %vm731_vm2, %v7172_v52 }
 0x148   : > { %6101 = vmatprep.mubr.msk.f32.mxu1 %vm731_vm2, %v7170_v51 }
 0x14a   : > { %5955 = vmatmul.mubr.msk.f32.gmra.mrb[44].mxu0 %vm731_vm2, %v7174_v53 }
 0x14b   : > { %6102 = vmatmul.mubr.msk.f32.gmra.mrb[10].mxu1 %vm731_vm2, %v7182_v56  ;;  %5957 = vmatprep.mubr.msk.f32.mxu0 %vm731_vm2, %v7192_v2 }
 0x14c   : > { %6104 = vmatprep.mubr.msk.f32.mxu1 %vm731_vm2, %v7190_v62 }
 0x14e   : > { %5958 = vmatmul.mubr.msk.f32.gmra.mrb[46].mxu0 %vm731_vm2, %v7194_v5 }
 0x14f   : > { %6105 = vmatmul.mubr.msk.f32.gmra.mrb[12].mxu1 %vm731_vm2, %v7202_v7  ;;  %5960 = vmatprep.mubr.msk.f32.mxu0 %vm731_vm2, %v7212_v18 }
 0x150   : > { %6107 = vmatprep.mubr.msk.f32.mxu1 %vm731_vm2, %v7210_v17 }
 0x152   : > { %5961 = vmatmul.mubr.msk.f32.gmra.mrb[48].mxu0 %vm731_vm2, %v7214_v19 }
 0x153   : > { %6108 = vmatmul.mubr.msk.f32.gmra.mrb[14].mxu1 %vm731_vm2, %v7222_v25  ;;  %5963 = vmatprep.mubr.msk.f32.mxu0 %vm731_vm2, %v7232_v36 }
 0x154   : > { %6110 = vmatprep.mubr.msk.f32.mxu1 %vm731_vm2, %v7230_v35 }
 0x156   : > { %5964 = vmatmul.mubr.msk.f32.gmra.mrb[50].mxu0 %vm731_vm2, %v7234_v37 }
 0x157   : > { %6111 = vmatmul.mubr.msk.f32.gmra.mrb[16].mxu1 %vm731_vm2, %v7242_v39  ;;  %5966 = vmatprep.mubr.msk.f32.mxu0 %vm731_vm2, %v7252_v55 }
 0x158   : > { %6113 = vmatprep.mubr.msk.f32.mxu1 %vm731_vm2, %v7250_v50 }
 0x15a   : > { %5967 = vmatmul.mubr.msk.f32.gmra.mrb[52].mxu0 %vm731_vm2, %v7254_v57 }
 0x15b   : > { %6114 = vmatmul.mubr.msk.f32.gmra.mrb[18].mxu1 %vm731_vm2, %v7262_v59  ;;  %5969 = vmatprep.mubr.msk.f32.mxu0 %vm731_vm2, %v7272_v15 }
 0x15c   : > { %6116 = vmatprep.mubr.msk.f32.mxu1 %vm731_vm2, %v7270_v13 }
 0x15e   : > { %5970 = vmatmul.mubr.msk.f32.gmra.mrb[54].mxu0 %vm731_vm2, %v7274_v16 }
 0x15f   : > { %6117 = vmatmul.mubr.msk.f32.gmra.mrb[20].mxu1 %vm731_vm2, %v7282_v26  ;;  %5972 = vmatprep.mubr.msk.f32.mxu0 %vm731_vm2, %v7292_v46 }
 0x160   : > { %6119 = vmatprep.mubr.msk.f32.mxu1 %vm731_vm2, %v7290_v44 }
 0x162   : > { %5973 = vmatmul.mubr.msk.f32.gmra.mrb[56].mxu0 %vm731_vm2, %v7294_v47 }
 0x163   : > { %6120 = vmatmul.mubr.msk.f32.gmra.mrb[22].mxu1 %vm731_vm2, %v7302_v49  ;;  %5975 = vmatprep.mubr.msk.f32.mxu0 %vm731_vm2, %v7312_v23 }
 0x164   : > { %6122 = vmatprep.mubr.msk.f32.mxu1 %vm731_vm2, %v7310_v9 }
 0x166   : > { %5976 = vmatmul.mubr.msk.f32.gmra.mrb[58].mxu0 %vm731_vm2, %v7314_v27 }
 0x167   : > { %6123 = vmatmul.mubr.msk.f32.gmra.mrb[24].mxu1 %vm731_vm2, %v7322_v29  ;;  %5978 = vmatprep.mubr.msk.f32.mxu0 %vm731_vm2, %v7331_v40 }
 0x168   : > { %6125 = vmatprep.mubr.msk.f32.mxu1 %vm731_vm2, %v7329_v48 }
 0x16a   : > { %5979 = vmatmul.mubr.msk.f32.gmra.mrb[60].mxu0 %vm731_vm2, %v8260_v54 }
 0x16b   : > { %6126 = vmatmul.mubr.msk.f32.gmra.mrb[26].mxu1 %vm731_vm2, %v8261_v63  ;;  %5981 = vmatprep.mubr.msk.f32.mxu0 %vm731_vm2, %v7348_v8 }
 0x16c   : > { %6128 = vmatprep.mubr.msk.f32.mxu1 %vm731_vm2, %v7346_v6 }
 0x16e   : > { %5982 = vmatmul.mubr.msk.f32.gmra.mrb[62].mxu0 %vm731_vm2, %v7350_v28 }
 0x16f   : > { %6129 = vmatmul.mubr.msk.f32.gmra.mrb[28].mxu1 %vm731_vm2, %v7356_v33  ;;  %5986 = vmatprep.mubr.msk.f32.mxu0 %vm731_vm2, %v1529_v0  ;;  %v7551_v0 = vld [vmem:[#allocation2 + $0x6a] sm:$0xff] }
 0x170   : > { %6131 = vmatprep.mubr.msk.f32.mxu1 %vm731_vm2, %v7500_v1  ;;  %8263 = vst [vmem:[#allocation4_spill] sm:$0xff] %v7551_v0 }
 0x172   : > { %5987 = vmatmul.mubr.msk.f32.vlgmr.msra.gmra.mrb[32].mxu0 %vm731_vm2, %v1530_v3  ;;  %v7557_v3 = vld [vmem:[#allocation2 + $0x7a] sm:$0xff] }
 0x173   : > { %6132 = vmatmul.mubr.msk.f32.gmra.mrb[30].mxu1 %vm731_vm2, %v7505_v4  ;;  %5989 = vmatprep.mubr.msk.f32.mxu0 %vm731_vm2, %v1531_v10  ;;  %8264 = vst [vmem:[#allocation5_spill] sm:$0xff] %v7557_v3 }
 0x174   : > { %6136 = vmatprep.mubr.msk.f32.mxu1 %vm731_vm2, %v1531_v10  ;;  %v7563_v10 = vld [vmem:[#allocation2 + $0x82] sm:$0xff] }
 0x175   : > { %8265 = vst [vmem:[#allocation6_spill] sm:$0xff] %v7563_v10 }
 0x176   : > { %5990 = vmatmul.mubr.msk.f32.gmra.mrb[34].mxu0 %vm731_vm2, %v1532_v14 }
 0x177   : > { %6137 = vmatmul.mubr.msk.f32.vlgmr.msra.gmra.mrb[0].mxu1 %vm731_vm2, %v1532_v14  ;;  %5992 = vmatprep.mubr.msk.f32.mxu0 %vm731_vm2, %v7519_v24  ;;  %v7569_v14 = vld [vmem:[#allocation2 + $0x92] sm:$0xff] }
 0x178   : > { %6185 = vmatpush3.msra.mxu1 %v7380_v61  ;;  %6139 = vmatprep.mubr.msk.f32.mxu1 %vm731_vm2, %v7519_v24  ;;  %v7545_v61 = vld [vmem:[#allocation2 + $0x62] sm:$0xff]  ;;  %8266 = vst [vmem:[#allocation7_spill] sm:$0xff] %v7569_v14 }
 0x179   : > { %6234 = vmatprep.subr.mxu1 %v7515_v20  ;;  %8262 = vst [vmem:[#allocation3_spill] sm:$0xff] %v7545_v61 }
 0x17a   : > { %5993 = vmatmul.mubr.msk.f32.gmra.mrb[36].mxu0 %vm731_vm2, %v7527_v30 }
 0x17b   : > { %6140 = vmatmul.mubr.msk.f32.gmra.mrb[2].mxu1 %vm731_vm2, %v7527_v30  ;;  %5995 = vmatprep.mubr.msk.f32.mxu0 %vm731_vm2, %v7533_v34 }
 0x17c   : > { %6142 = vmatprep.mubr.msk.f32.mxu1 %vm731_vm2, %v7533_v34 }
 0x17e   : > { %5996 = vmatmul.mubr.msk.f32.gmra.mrb[38].mxu0 %vm731_vm2, %v7539_v38 }
 0x17f   : > { %6143 = vmatmul.mubr.msk.f32.gmra.mrb[4].mxu1 %vm731_vm2, %v7539_v38  ;;  %5998 = vmatprep.mubr.msk.f32.mxu0 %vm731_vm2, %v7545_v61 }
 0x180   : > { %6145 = vmatprep.mubr.msk.f32.mxu1 %vm731_vm2, %v7545_v61  ;;  %v7695_v61 = vld [vmem:[#allocation2 + $0x18a] sm:$0xff] }
 0x182   : > { %5999 = vmatmul.mubr.msk.f32.gmra.mrb[40].mxu0 %vm731_vm2, %v7551_v0 }
 0x183   : > { %6146 = vmatmul.mubr.msk.f32.gmra.mrb[6].mxu1 %vm731_vm2, %v7551_v0  ;;  %6001 = vmatprep.mubr.msk.f32.mxu0 %vm731_vm2, %v7557_v3  ;;  %v7575_v0 = vld [vmem:[#allocation2 + $0x9a] sm:$0xff] }
 0x184   : > { %6148 = vmatprep.mubr.msk.f32.mxu1 %vm731_vm2, %v7557_v3  ;;  %8267 = vst [vmem:[#allocation8_spill] sm:$0xff] %v7575_v0  ;;  %v7581_v3 = vld [vmem:[#allocation2 + $0xaa] sm:$0xff] }
 0x185   : > { %8268 = vst [vmem:[#allocation9_spill] sm:$0xff] %v7581_v3 }
 0x186   : > { %6002 = vmatmul.mubr.msk.f32.gmra.mrb[42].mxu0 %vm731_vm2, %v7563_v10 }
 0x187   : > { %6149 = vmatmul.mubr.msk.f32.gmra.mrb[8].mxu1 %vm731_vm2, %v7563_v10  ;;  %6004 = vmatprep.mubr.msk.f32.mxu0 %vm731_vm2, %v7569_v14  ;;  %v7587_v10 = vld [vmem:[#allocation2 + $0xb2] sm:$0xff] }
 0x188   : > { %6151 = vmatprep.mubr.msk.f32.mxu1 %vm731_vm2, %v7569_v14  ;;  %8269 = vst [vmem:[#allocation10_spill] sm:$0xff] %v7587_v10  ;;  %v7593_v14 = vld [vmem:[#allocation2 + $0xc2] sm:$0xff] }
 0x189   : > { %8270 = vst [vmem:[#allocation11_spill] sm:$0xff] %v7593_v14 }
 0x18a   : > { %6005 = vmatmul.mubr.msk.f32.gmra.mrb[44].mxu0 %vm731_vm2, %v7575_v0 }
 0x18b   : > { %6152 = vmatmul.mubr.msk.f32.gmra.mrb[10].mxu1 %vm731_vm2, %v7575_v0  ;;  %6007 = vmatprep.mubr.msk.f32.mxu0 %vm731_vm2, %v7581_v3  ;;  %v7599_v0 = vld [vmem:[#allocation2 + $0xca] sm:$0xff] }
 0x18c   : > { %6154 = vmatprep.mubr.msk.f32.mxu1 %vm731_vm2, %v7581_v3  ;;  %8271 = vst [vmem:[#allocation12_spill] sm:$0xff] %v7599_v0  ;;  %v7605_v3 = vld [vmem:[#allocation2 + $0xda] sm:$0xff] }
 0x18d   : > { %8272 = vst [vmem:[#allocation13_spill] sm:$0xff] %v7605_v3 }
 0x18e   : > { %6008 = vmatmul.mubr.msk.f32.gmra.mrb[46].mxu0 %vm731_vm2, %v7587_v10 }
 0x18f   : > { %6155 = vmatmul.mubr.msk.f32.gmra.mrb[12].mxu1 %vm731_vm2, %v7587_v10  ;;  %6010 = vmatprep.mubr.msk.f32.mxu0 %vm731_vm2, %v7593_v14  ;;  %v7611_v10 = vld [vmem:[#allocation2 + $0xe2] sm:$0xff] }
 0x190   : > { %6157 = vmatprep.mubr.msk.f32.mxu1 %vm731_vm2, %v7593_v14  ;;  %8273 = vst [vmem:[#allocation14_spill] sm:$0xff] %v7611_v10  ;;  %v7617_v14 = vld [vmem:[#allocation2 + $0xf2] sm:$0xff] }
 0x191   : > { %8274 = vst [vmem:[#allocation15_spill] sm:$0xff] %v7617_v14 }
 0x192   : > { %6011 = vmatmul.mubr.msk.f32.gmra.mrb[48].mxu0 %vm731_vm2, %v7599_v0 }
 0x193   : > { %6158 = vmatmul.mubr.msk.f32.gmra.mrb[14].mxu1 %vm731_vm2, %v7599_v0  ;;  %6013 = vmatprep.mubr.msk.f32.mxu0 %vm731_vm2, %v7605_v3  ;;  %v7623_v0 = vld [vmem:[#allocation2 + $0xfa] sm:$0xff] }
 0x194   : > { %6160 = vmatprep.mubr.msk.f32.mxu1 %vm731_vm2, %v7605_v3  ;;  %8275 = vst [vmem:[#allocation16_spill] sm:$0xff] %v7623_v0  ;;  %v7629_v3 = vld [vmem:[#allocation2 + $0x10a] sm:$0xff] }
 0x195   : > { %8276 = vst [vmem:[#allocation17_spill] sm:$0xff] %v7629_v3 }
 0x196   : > { %6014 = vmatmul.mubr.msk.f32.gmra.mrb[50].mxu0 %vm731_vm2, %v7611_v10 }
 0x197   : > { %6161 = vmatmul.mubr.msk.f32.gmra.mrb[16].mxu1 %vm731_vm2, %v7611_v10  ;;  %6016 = vmatprep.mubr.msk.f32.mxu0 %vm731_vm2, %v7617_v14  ;;  %v7635_v10 = vld [vmem:[#allocation2 + $0x112] sm:$0xff] }
 0x198   : > { %6163 = vmatprep.mubr.msk.f32.mxu1 %vm731_vm2, %v7617_v14  ;;  %8277 = vst [vmem:[#allocation18_spill] sm:$0xff] %v7635_v10  ;;  %v7641_v14 = vld [vmem:[#allocation2 + $0x122] sm:$0xff] }
 0x199   : > { %8278 = vst [vmem:[#allocation19_spill] sm:$0xff] %v7641_v14 }
 0x19a   : > { %6017 = vmatmul.mubr.msk.f32.gmra.mrb[52].mxu0 %vm731_vm2, %v7623_v0 }
 0x19b   : > { %6164 = vmatmul.mubr.msk.f32.gmra.mrb[18].mxu1 %vm731_vm2, %v7623_v0  ;;  %6019 = vmatprep.mubr.msk.f32.mxu0 %vm731_vm2, %v7629_v3  ;;  %v7647_v0 = vld [vmem:[#allocation2 + $0x12a] sm:$0xff] }
 0x19c   : > { %6166 = vmatprep.mubr.msk.f32.mxu1 %vm731_vm2, %v7629_v3  ;;  %8279 = vst [vmem:[#allocation20_spill] sm:$0xff] %v7647_v0  ;;  %v7653_v3 = vld [vmem:[#allocation2 + $0x13a] sm:$0xff] }
 0x19d   : > { %8280 = vst [vmem:[#allocation21_spill] sm:$0xff] %v7653_v3 }
 0x19e   : > { %6020 = vmatmul.mubr.msk.f32.gmra.mrb[54].mxu0 %vm731_vm2, %v7635_v10 }
 0x19f   : > { %6167 = vmatmul.mubr.msk.f32.gmra.mrb[20].mxu1 %vm731_vm2, %v7635_v10  ;;  %6022 = vmatprep.mubr.msk.f32.mxu0 %vm731_vm2, %v7641_v14  ;;  %v7659_v10 = vld [vmem:[#allocation2 + $0x142] sm:$0xff] }
 0x1a0   : > { %6169 = vmatprep.mubr.msk.f32.mxu1 %vm731_vm2, %v7641_v14  ;;  %8281 = vst [vmem:[#allocation22_spill] sm:$0xff] %v7659_v10  ;;  %v7665_v14 = vld [vmem:[#allocation2 + $0x152] sm:$0xff] }
 0x1a1   : > { %8282 = vst [vmem:[#allocation23_spill] sm:$0xff] %v7665_v14 }
 0x1a2   : > { %6023 = vmatmul.mubr.msk.f32.gmra.mrb[56].mxu0 %vm731_vm2, %v7647_v0 }
 0x1a3   : > { %6170 = vmatmul.mubr.msk.f32.gmra.mrb[22].mxu1 %vm731_vm2, %v7647_v0  ;;  %6025 = vmatprep.mubr.msk.f32.mxu0 %vm731_vm2, %v7653_v3  ;;  %v7671_v0 = vld [vmem:[#allocation2 + $0x15a] sm:$0xff] }
 0x1a4   : > { %6172 = vmatprep.mubr.msk.f32.mxu1 %vm731_vm2, %v7653_v3  ;;  %8283 = vst [vmem:[#allocation24_spill] sm:$0xff] %v7671_v0  ;;  %v7677_v3 = vld [vmem:[#allocation2 + $0x16a] sm:$0xff] }
 0x1a6   : > { %6026 = vmatmul.mubr.msk.f32.gmra.mrb[58].mxu0 %vm731_vm2, %v7659_v10 }
 0x1a7   : > { %6173 = vmatmul.mubr.msk.f32.gmra.mrb[24].mxu1 %vm731_vm2, %v7659_v10  ;;  %6028 = vmatprep.mubr.msk.f32.mxu0 %vm731_vm2, %v7665_v14  ;;  %v7683_v10 = vld [vmem:[#allocation2 + $0x172] sm:$0xff] }
 0x1a8   : > { %6175 = vmatprep.mubr.msk.f32.mxu1 %vm731_vm2, %v7665_v14  ;;  %8284 = vst [vmem:[#allocation25_spill] sm:$0xff] %v7683_v10  ;;  %v7689_v14 = vld [vmem:[#allocation2 + $0x182] sm:$0xff] }
 0x1aa   : > { %6029 = vmatmul.mubr.msk.f32.gmra.mrb[60].mxu0 %vm731_vm2, %v7671_v0 }
 0x1ab   : > { %6176 = vmatmul.mubr.msk.f32.gmra.mrb[26].mxu1 %vm731_vm2, %v7671_v0  ;;  %6031 = vmatprep.mubr.msk.f32.mxu0 %vm731_vm2, %v7677_v3  ;;  %v6795_v0 = vld [vmem:[%s6907_s16] sm:$0xff] }
 0x1ac   : > { %6178 = vmatprep.mubr.msk.f32.mxu1 %vm731_vm2, %v7677_v3 }
 0x1ae   : > { %6032 = vmatmul.mubr.msk.f32.gmra.mrb[62].mxu0 %vm731_vm2, %v7683_v10 }
 0x1af   : > { %6179 = vmatmul.mubr.msk.f32.gmra.mrb[28].mxu1 %vm731_vm2, %v7683_v10  ;;  %6336 = vmatprep.mubr.msk.f32.mxu0 %vm373_vm1, %v6795_v0  ;;  %v5333_v10 = vld [vmem:[%s8224_s3 + $0x40] sm:$0xff] }
 0x1b0   : > { %6181 = vmatprep.mubr.msk.f32.mxu1 %vm731_vm2, %v7689_v14  ;;  %v8295_v0 = vld [vmem:[#allocation13_spill] sm:$0xff] }
 0x1b3   : > { %6182 = vmatmul.mubr.msk.f32.gmra.mrb[30].mxu1 %vm731_vm2, %v7695_v61 }
 0x1b4   : > { %6186 = vmatprep.mubr.msk.f32.mxu1 %vm731_vm2, %v7091_v11  ;;  %v3108_v11 = vld [vmem:[#allocation2 + $0x198] sm:$0xff] }
 0x1b7   : > { %6187 = vmatmul.mubr.msk.f32.vlgmr.msra.gmra.mrb[0].mxu1 %vm731_vm2, %v7093_v12  ;;  %v3109_v12 = vld [vmem:[#allocation2 + $0x1a0] sm:$0xff] }
 0x1b8   : > { %6235 = vmatpush3.msra.mxu1 %v7515_v20  ;;  %6189 = vmatprep.mubr.msk.f32.mxu1 %vm731_vm2, %v7112_v21  ;;  %v3465_v21 = vld [vmem:[#allocation2 + $0x31] sm:$0xff]  ;;  %v8292_v20 = vld [vmem:[#allocation10_spill] sm:$0xff] }
 0x1b9   : > { %6284 = vmatprep.subr.mxu1 %v5333_v10 }
 0x1bb   : > { %6190 = vmatmul.mubr.msk.f32.gmra.mrb[2].mxu1 %vm731_vm2, %v7114_v22  ;;  %v3466_v22 = vld [vmem:[#allocation2 + $0x39] sm:$0xff] }
 0x1bc   : > { %6192 = vmatprep.mubr.msk.f32.mxu1 %vm731_vm2, %v7132_v31  ;;  %v3467_v31 = vld [vmem:[#allocation2 + $0x49] sm:$0xff] }
 0x1bf   : > { %6193 = vmatmul.mubr.msk.f32.gmra.mrb[4].mxu1 %vm731_vm2, %v7134_v32  ;;  %v3468_v32 = vld [vmem:[#allocation2 + $0x51] sm:$0xff] }
 0x1c0   : > { %6195 = vmatprep.mubr.msk.f32.mxu1 %vm731_vm2, %v7152_v42  ;;  %v3469_v42 = vld [vmem:[#allocation2 + $0x61] sm:$0xff] }
 0x1c3   : > { %6196 = vmatmul.mubr.msk.f32.gmra.mrb[6].mxu1 %vm731_vm2, %v7154_v43  ;;  %v3470_v43 = vld [vmem:[#allocation2 + $0x69] sm:$0xff] }
 0x1c4   : > { %6198 = vmatprep.mubr.msk.f32.mxu1 %vm731_vm2, %v7172_v52  ;;  %v4310_v52 = vld [vmem:[%s8228_s7] sm:$0xf] }
 0x1c5   : > { %6334 = vmatprep.subr.msk.mxu0 %vm470_vm0, %v4310_v52 }
 0x1c6   : > { %6335 = vmatpush3.msk.msra.mxu0 %vm470_vm0, %v4310_v52 }
 0x1c7   : > { %6199 = vmatmul.mubr.msk.f32.gmra.mrb[8].mxu1 %vm731_vm2, %v7174_v53  ;;  %v4546_v53 = vld [vmem:[%s8226_s5] sm:$0xff] }
 0x1c8   : > { %6201 = vmatprep.mubr.msk.f32.mxu1 %vm731_vm2, %v7192_v2  ;;  %6384 = vmatprep.subr.mxu0 %v4546_v53  ;;  %v6799_v2 = vld [vmem:[%s6907_s16 + $0x20] sm:$0xff] }
 0x1cb   : > { %6202 = vmatmul.mubr.msk.f32.gmra.mrb[10].mxu1 %vm731_vm2, %v7194_v5  ;;  %v6802_v5 = vld [vmem:[%s6907_s16 + $0x38] sm:$0xff] }
 0x1cc   : > { %6204 = vmatprep.mubr.msk.f32.mxu1 %vm731_vm2, %v7212_v18  ;;  %v6805_v18 = vld [vmem:[%s6907_s16 + $0x50] sm:$0xff] }
 0x1cf   : > { %6205 = vmatmul.mubr.msk.f32.gmra.mrb[12].mxu1 %vm731_vm2, %v7214_v19  ;;  %v6806_v19 = vld [vmem:[%s6907_s16 + $0x58] sm:$0xff] }
 0x1d0   : > { %6207 = vmatprep.mubr.msk.f32.mxu1 %vm731_vm2, %v7232_v36  ;;  %v6809_v36 = vld [vmem:[%s6907_s16 + $0x70] sm:$0xff] }
 0x1d3   : > { %6208 = vmatmul.mubr.msk.f32.gmra.mrb[14].mxu1 %vm731_vm2, %v7234_v37  ;;  %v6810_v37 = vld [vmem:[%s6907_s16 + $0x78] sm:$0xff] }
 0x1d4   : > { %6210 = vmatprep.mubr.msk.f32.mxu1 %vm731_vm2, %v7252_v55  ;;  %v6813_v55 = vld [vmem:[%s6907_s16 + $0x90] sm:$0xff] }
 0x1d7   : > { %6211 = vmatmul.mubr.msk.f32.gmra.mrb[16].mxu1 %vm731_vm2, %v7254_v57  ;;  %v6814_v57 = vld [vmem:[%s6907_s16 + $0x98] sm:$0xff] }
 0x1d8   : > { %6213 = vmatprep.mubr.msk.f32.mxu1 %vm731_vm2, %v7272_v15  ;;  %v6816_v15 = vld [vmem:[%s6907_s16 + $0xa8] sm:$0xff] }
 0x1db   : > { %6214 = vmatmul.mubr.msk.f32.gmra.mrb[18].mxu1 %vm731_vm2, %v7274_v16  ;;  %v6817_v16 = vld [vmem:[%s6907_s16 + $0xb0] sm:$0xff] }
 0x1dc   : > { %6216 = vmatprep.mubr.msk.f32.mxu1 %vm731_vm2, %v7292_v46  ;;  %v6819_v46 = vld [vmem:[%s6907_s16 + $0xc0] sm:$0xff] }
 0x1df   : > { %6217 = vmatmul.mubr.msk.f32.gmra.mrb[20].mxu1 %vm731_vm2, %v7294_v47  ;;  %v6820_v47 = vld [vmem:[%s6907_s16 + $0xc8] sm:$0xff] }
 0x1e0   : > { %6219 = vmatprep.mubr.msk.f32.mxu1 %vm731_vm2, %v7312_v23  ;;  %v6823_v23 = vld [vmem:[%s6907_s16 + $0xe0] sm:$0xff] }
 0x1e3   : > { %6220 = vmatmul.mubr.msk.f32.gmra.mrb[22].mxu1 %vm731_vm2, %v7314_v27  ;;  %v8285_v27 = vld [vmem:[#allocation3_spill] sm:$0xff] }
 0x1e4   : > { %6222 = vmatprep.mubr.msk.f32.mxu1 %vm731_vm2, %v7331_v40  ;;  %v6825_v40 = vld [vmem:[%s6907_s16 + $0xf0] sm:$0xff] }
 0x1e7   : > { %6223 = vmatmul.mubr.msk.f32.gmra.mrb[24].mxu1 %vm731_vm2, %v8260_v54 }
 0x1e8   : > { %6225 = vmatprep.mubr.msk.f32.mxu1 %vm731_vm2, %v7348_v8  ;;  %v8289_v8 = vld [vmem:[#allocation7_spill] sm:$0xff] }
 0x1eb   : > { %6226 = vmatmul.mubr.msk.f32.gmra.mrb[26].mxu1 %vm731_vm2, %v7350_v28 }
 0x1ec   : > { %6228 = vmatprep.mubr.msk.f32.mxu1 %vm731_vm2, %v7363_v60  ;;  %v6826_v60 = vld [vmem:[%s6907_s16 + $0xf8] sm:$0xff] }
 0x1ef   : > { %6229 = vmatmul.mubr.msk.f32.gmra.mrb[28].mxu1 %vm731_vm2, %v7365_v58  ;;  %v8287_v58 = vld [vmem:[#allocation5_spill] sm:$0xff] }
 0x1f0   : > { %6231 = vmatprep.mubr.msk.f32.mxu1 %vm731_vm2, %v3108_v11 }
 0x1f3   : > { %6232 = vmatmul.mubr.msk.f32.gmra.mrb[30].mxu1 %vm731_vm2, %v3109_v12  ;;  %v8296_v12 = vld [vmem:[#allocation14_spill] sm:$0xff] }
 0x1f4   : > { %6236 = vmatprep.mubr.msk.f32.mxu1 %vm731_vm2, %v3465_v21  ;;  %v8297_v21 = vld [vmem:[#allocation15_spill] sm:$0xff] }
 0x1f7   : > { %6237 = vmatmul.mubr.msk.f32.vlgmr.msra.gmra.mrb[0].mxu1 %vm731_vm2, %v3466_v22 }
 0x1f8   : > { %6285 = vmatpush3.msra.mxu1 %v5333_v10  ;;  %6239 = vmatprep.mubr.msk.f32.mxu1 %vm731_vm2, %v3467_v31 }
 0x1fb   : > { %6240 = vmatmul.mubr.msk.f32.gmra.mrb[2].mxu1 %vm731_vm2, %v3468_v32  ;;  %v8298_v32 = vld [vmem:[#allocation16_spill] sm:$0xff] }
 0x1fc   : > { %6242 = vmatprep.mubr.msk.f32.mxu1 %vm731_vm2, %v3469_v42  ;;  %v8299_v42 = vld [vmem:[#allocation17_spill] sm:$0xff] }
 0x1ff   : > { %6243 = vmatmul.mubr.msk.f32.gmra.mrb[4].mxu1 %vm731_vm2, %v3470_v43 }
 0x200   : > { %6245 = vmatprep.mubr.msk.f32.mxu1 %vm731_vm2, %v7150_v41  ;;  %v6796_v41 = vld [vmem:[%s6907_s16 + $0x8] sm:$0xff] }
 0x201   : > { %6337 = vmatmul.mubr.msk.f32.vlgmr.msra.gmra.mrb[64].mxu0 %vm373_vm1, %v6796_v41  ;;  %v8301_v41 = vld [vmem:[#allocation19_spill] sm:$0xff] }
 0x202   : > { %6385 = vmatpush3.msra.mxu0 %v4546_v53  ;;  %v8300_v53 = vld [vmem:[#allocation18_spill] sm:$0xff] }
 0x203   : > { %6246 = vmatmul.mubr.msk.f32.gmra.mrb[6].mxu1 %vm731_vm2, %v7162_v45  ;;  %v6797_v45 = vld [vmem:[%s6907_s16 + $0x10] sm:$0xff] }
 0x204   : > { %6248 = vmatprep.mubr.msk.f32.mxu1 %vm731_vm2, %v7170_v51  ;;  %6339 = vmatprep.mubr.msk.f32.mxu0 %vm373_vm1, %v6797_v45  ;;  %v6798_v51 = vld [vmem:[%s6907_s16 + $0x18] sm:$0xff] }
 0x205   : > { %6340 = vmatmul.mubr.msk.f32.gmra.mrb[66].mxu0 %vm373_vm1, %v6798_v51 }
 0x206   : > { %6342 = vmatprep.mubr.msk.f32.mxu0 %vm373_vm1, %v6799_v2  ;;  %v8302_v2 = vld [vmem:[#allocation20_spill] sm:$0xff] }
 0x207   : > { %6249 = vmatmul.mubr.msk.f32.gmra.mrb[8].mxu1 %vm731_vm2, %v7182_v56  ;;  %v6800_v56 = vld [vmem:[%s6907_s16 + $0x28] sm:$0xff] }
 0x208   : > { %6251 = vmatprep.mubr.msk.f32.mxu1 %vm731_vm2, %v7190_v62  ;;  %v6801_v62 = vld [vmem:[%s6907_s16 + $0x30] sm:$0xff] }
 0x209   : > { %6343 = vmatmul.mubr.msk.f32.gmra.mrb[68].mxu0 %vm373_vm1, %v6800_v56  ;;  %v8303_v56 = vld [vmem:[#allocation21_spill] sm:$0xff] }
 0x20a   : > { %6345 = vmatprep.mubr.msk.f32.mxu0 %vm373_vm1, %v6801_v62 }
 0x20b   : > { %6252 = vmatmul.mubr.msk.f32.gmra.mrb[10].mxu1 %vm731_vm2, %v7202_v7  ;;  %v6803_v7 = vld [vmem:[%s6907_s16 + $0x40] sm:$0xff] }
 0x20c   : > { %6254 = vmatprep.mubr.msk.f32.mxu1 %vm731_vm2, %v7210_v17  ;;  %v6804_v17 = vld [vmem:[%s6907_s16 + $0x48] sm:$0xff] }
 0x20d   : > { %6346 = vmatmul.mubr.msk.f32.gmra.mrb[70].mxu0 %vm373_vm1, %v6802_v5 }
 0x20e   : > { %6348 = vmatprep.mubr.msk.f32.mxu0 %vm373_vm1, %v6803_v7  ;;  %v8304_v7 = vld [vmem:[#allocation22_spill] sm:$0xff] }
 0x20f   : > { %6255 = vmatmul.mubr.msk.f32.gmra.mrb[12].mxu1 %vm731_vm2, %v7222_v25  ;;  %v6807_v25 = vld [vmem:[%s6907_s16 + $0x60] sm:$0xff] }
 0x210   : > { %6257 = vmatprep.mubr.msk.f32.mxu1 %vm731_vm2, %v7230_v35  ;;  %v6808_v35 = vld [vmem:[%s6907_s16 + $0x68] sm:$0xff] }
 0x211   : > { %6349 = vmatmul.mubr.msk.f32.gmra.mrb[72].mxu0 %vm373_vm1, %v6804_v17  ;;  %v8305_v17 = vld [vmem:[#allocation23_spill] sm:$0xff] }
 0x212   : > { %6351 = vmatprep.mubr.msk.f32.mxu0 %vm373_vm1, %v6805_v18 }
 0x213   : > { %6258 = vmatmul.mubr.msk.f32.gmra.mrb[14].mxu1 %vm731_vm2, %v7242_v39  ;;  %v6811_v39 = vld [vmem:[%s6907_s16 + $0x80] sm:$0xff] }
 0x214   : > { %6260 = vmatprep.mubr.msk.f32.mxu1 %vm731_vm2, %v7250_v50  ;;  %v6812_v50 = vld [vmem:[%s6907_s16 + $0x88] sm:$0xff] }
 0x215   : > { %6352 = vmatmul.mubr.msk.f32.gmra.mrb[74].mxu0 %vm373_vm1, %v6806_v19 }
 0x216   : > { %6354 = vmatprep.mubr.msk.f32.mxu0 %vm373_vm1, %v6807_v25  ;;  %v8306_v25 = vld [vmem:[#allocation24_spill] sm:$0xff] }
 0x217   : > { %6261 = vmatmul.mubr.msk.f32.gmra.mrb[16].mxu1 %vm731_vm2, %v7262_v59  ;;  %v6815_v59 = vld [vmem:[%s6907_s16 + $0xa0] sm:$0xff] }
 0x218   : > { %6263 = vmatprep.mubr.msk.f32.mxu1 %vm731_vm2, %v7270_v13  ;;  %v3495_v13 = vld [vmem:[#allocation2 + $0x199] sm:$0xff] }
 0x219   : > { %6355 = vmatmul.mubr.msk.f32.gmra.mrb[76].mxu0 %vm373_vm1, %v6808_v35 }
 0x21a   : > { %6357 = vmatprep.mubr.msk.f32.mxu0 %vm373_vm1, %v6809_v36 }
 0x21b   : > { %6264 = vmatmul.mubr.msk.f32.gmra.mrb[18].mxu1 %vm731_vm2, %v7282_v26  ;;  %v3496_v26 = vld [vmem:[#allocation2 + $0x1a1] sm:$0xff] }
 0x21c   : > { %6266 = vmatprep.mubr.msk.f32.mxu1 %vm731_vm2, %v7290_v44  ;;  %v6818_v44 = vld [vmem:[%s6907_s16 + $0xb8] sm:$0xff] }
 0x21d   : > { %6358 = vmatmul.mubr.msk.f32.gmra.mrb[78].mxu0 %vm373_vm1, %v6810_v37  ;;  %v8307_v37 = vld [vmem:[#allocation25_spill] sm:$0xff] }
 0x21e   : > { %6360 = vmatprep.mubr.msk.f32.mxu0 %vm373_vm1, %v6811_v39  ;;  %v3882_v39 = vld [vmem:[#allocation2 + $0x19a] sm:$0xff] }
 0x21f   : > { %6267 = vmatmul.mubr.msk.f32.gmra.mrb[20].mxu1 %vm731_vm2, %v7302_v49  ;;  %v6821_v49 = vld [vmem:[%s6907_s16 + $0xd0] sm:$0xff] }
 0x220   : > { %6269 = vmatprep.mubr.msk.f32.mxu1 %vm731_vm2, %v7310_v9  ;;  %v6822_v9 = vld [vmem:[%s6907_s16 + $0xd8] sm:$0xff] }
 0x221   : > { %6361 = vmatmul.mubr.msk.f32.gmra.mrb[80].mxu0 %vm373_vm1, %v6812_v50 }
 0x222   : > { %6363 = vmatprep.mubr.msk.f32.mxu0 %vm373_vm1, %v6813_v55 }
 0x223   : > { %6270 = vmatmul.mubr.msk.f32.gmra.mrb[22].mxu1 %vm731_vm2, %v7322_v29  ;;  %v6824_v29 = vld [vmem:[%s6907_s16 + $0xe8] sm:$0xff] }
 0x224   : > { %6272 = vmatprep.mubr.msk.f32.mxu1 %vm731_vm2, %v7329_v48  ;;  %v8286_v48 = vld [vmem:[#allocation4_spill] sm:$0xff] }
 0x225   : > { %6364 = vmatmul.mubr.msk.f32.gmra.mrb[82].mxu0 %vm373_vm1, %v6814_v57 }
 0x226   : > { %6366 = vmatprep.mubr.msk.f32.mxu0 %vm373_vm1, %v6815_v59 }
 0x227   : > { %6273 = vmatmul.mubr.msk.f32.gmra.mrb[24].mxu1 %vm731_vm2, %v8261_v63  ;;  %v8291_v63 = vld [vmem:[#allocation9_spill] sm:$0xff] }
 0x228   : > { %6275 = vmatprep.mubr.msk.f32.mxu1 %vm731_vm2, %v7346_v6  ;;  %v8288_v6 = vld [vmem:[#allocation6_spill] sm:$0xff] }
 0x229   : > { %6367 = vmatmul.mubr.msk.f32.gmra.mrb[84].mxu0 %vm373_vm1, %v6816_v15 }
 0x22a   : > { %6369 = vmatprep.mubr.msk.f32.mxu0 %vm373_vm1, %v6817_v16 }
 0x22b   : > { %6276 = vmatmul.mubr.msk.f32.gmra.mrb[26].mxu1 %vm731_vm2, %v7356_v33  ;;  %v8290_v33 = vld [vmem:[#allocation8_spill] sm:$0xff] }
 0x22c   : > { %6278 = vmatprep.mubr.msk.f32.mxu1 %vm731_vm2, %v7500_v1 }
 0x22d   : > { %6370 = vmatmul.mubr.msk.f32.gmra.mrb[86].mxu0 %vm373_vm1, %v6818_v44 }
 0x22e   : > { %6372 = vmatprep.mubr.msk.f32.mxu0 %vm373_vm1, %v6819_v46 }
 0x22f   : > { %6279 = vmatmul.mubr.msk.f32.gmra.mrb[28].mxu1 %vm731_vm2, %v7505_v4 }
 0x230   : > { %6281 = vmatprep.mubr.msk.f32.mxu1 %vm731_vm2, %v3495_v13 }
 0x231   : > { %6373 = vmatmul.mubr.msk.f32.gmra.mrb[88].mxu0 %vm373_vm1, %v6820_v47 }
 0x232   : > { %6375 = vmatprep.mubr.msk.f32.mxu0 %vm373_vm1, %v6821_v49  ;;  %v8014_v49 = vld [vmem:[%s8225_s4] ss:$0 sm:$0xff] }
 0x233   : > { %6282 = vmatmul.mubr.msk.f32.gmra.mrb[30].mxu1 %vm731_vm2, %v3496_v26 }
 0x234   : > { %6286 = vmatprep.mubr.msk.f32.mxu1 %vm731_vm2, %v7519_v24  ;;  %v8293_v24 = vld [vmem:[#allocation11_spill] sm:$0xff] }
 0x235   : > { %6376 = vmatmul.mubr.msk.f32.gmra.mrb[90].mxu0 %vm373_vm1, %v6822_v9 }
 0x236   : > { %6378 = vmatprep.mubr.msk.f32.mxu0 %vm373_vm1, %v6823_v23 }
 0x237   : > { %6287 = vmatmul.mubr.msk.f32.vlgmr.msra.gmra.mrb[0].mxu1 %vm731_vm2, %v7527_v30 }
 0x238   : > { %6289 = vmatprep.mubr.msk.f32.mxu1 %vm731_vm2, %v7533_v34 }
 0x239   : > { %6379 = vmatmul.mubr.msk.f32.gmra.mrb[92].mxu0 %vm373_vm1, %v6824_v29 }
 0x23a   : > { %6381 = vmatprep.mubr.msk.f32.mxu0 %vm373_vm1, %v6825_v40 }
 0x23b   : > { %6290 = vmatmul.mubr.msk.f32.gmra.mrb[2].mxu1 %vm731_vm2, %v7539_v38  ;;  %v8294_v38 = vld [vmem:[#allocation12_spill] sm:$0xff] }
 0x23c   : > { %6292 = vmatprep.mubr.msk.f32.mxu1 %vm731_vm2, %v8285_v27 }
 0x23d   : > { %6382 = vmatmul.mubr.msk.f32.gmra.mrb[94].mxu0 %vm373_vm1, %v6826_v60 }
 0x23f   : > { %6293 = vmatmul.mubr.msk.f32.gmra.mrb[4].mxu1 %vm731_vm2, %v8286_v48 }
 0x240   : > { %6295 = vmatprep.mubr.msk.f32.mxu1 %vm731_vm2, %v8287_v58 }
 0x243   : > { %6296 = vmatmul.mubr.msk.f32.gmra.mrb[6].mxu1 %vm731_vm2, %v8288_v6 }
 0x244   : > { %6298 = vmatprep.mubr.msk.f32.mxu1 %vm731_vm2, %v8289_v8 }
 0x245   : > { %v5988_v28 = vpop.f32.mrb[32].mxu0 }
 0x246   : > { %v1725_v54 = vpop.f32.mrb[33].mxu0 }
 0x247   : > { %6299 = vmatmul.mubr.msk.f32.gmra.mrb[8].mxu1 %vm731_vm2, %v8290_v33 }
 0x248   : > { %6301 = vmatprep.mubr.msk.f32.mxu1 %vm731_vm2, %v8291_v63 }
 0x249   : > { %v5991_v1 = vpop.f32.mrb[34].mxu0 }
 0x24a   : > { %v7913_v4 = vpop.f32.mrb[35].mxu0 }
 0x24b   : > { %6302 = vmatmul.mubr.msk.f32.gmra.mrb[10].mxu1 %vm731_vm2, %v8292_v20 }
 0x24c   : > { %6304 = vmatprep.mubr.msk.f32.mxu1 %vm731_vm2, %v8293_v24 }
 0x24d   : > { %v7919_v30 = vpop.f32.mrb[36].mxu0 }
 0x24e   : > { %v7921_v34 = vpop.f32.mrb[37].mxu0 }
 0x24f   : > { %6305 = vmatmul.mubr.msk.f32.gmra.mrb[12].mxu1 %vm731_vm2, %v8294_v38 }
 0x250   : > { %6307 = vmatprep.mubr.msk.f32.mxu1 %vm731_vm2, %v8295_v0 }
 0x251   : > { %v7927_v10 = vpop.f32.mrb[38].mxu0 }
 0x252   : > { %v7929_v11 = vpop.f32.mrb[39].mxu0 }
 0x253   : > { %6308 = vmatmul.mubr.msk.f32.gmra.mrb[14].mxu1 %vm731_vm2, %v8296_v12 }
 0x254   : > { %6310 = vmatprep.mubr.msk.f32.mxu1 %vm731_vm2, %v8297_v21 }
 0x255   : > { %v7935_v22 = vpop.f32.mrb[40].mxu0 }
 0x256   : > { %v7937_v31 = vpop.f32.mrb[41].mxu0 }
 0x257   : > { %6311 = vmatmul.mubr.msk.f32.gmra.mrb[16].mxu1 %vm731_vm2, %v8298_v32 }
 0x258   : > { %6313 = vmatprep.mubr.msk.f32.mxu1 %vm731_vm2, %v8299_v42 }
 0x259   : > { %v7943_v43 = vpop.f32.mrb[42].mxu0 }
 0x25a   : > { %v7945_v52 = vpop.f32.mrb[43].mxu0 }
 0x25b   : > { %6314 = vmatmul.mubr.msk.f32.gmra.mrb[18].mxu1 %vm731_vm2, %v8300_v53 }
 0x25c   : > { %6316 = vmatprep.mubr.msk.f32.mxu1 %vm731_vm2, %v8301_v41 }
 0x25d   : > { %v7951_v45 = vpop.f32.mrb[44].mxu0 }
 0x25e   : > { %v7953_v51 = vpop.f32.mrb[45].mxu0 }
 0x25f   : > { %6317 = vmatmul.mubr.msk.f32.gmra.mrb[20].mxu1 %vm731_vm2, %v8302_v2 }
 0x260   : > { %6319 = vmatprep.mubr.msk.f32.mxu1 %vm731_vm2, %v8303_v56 }
 0x261   : > { %v7959_v62 = vpop.f32.mrb[46].mxu0 }
 0x262   : > { %v7961_v5 = vpop.f32.mrb[47].mxu0 }
 0x263   : > { %6320 = vmatmul.mubr.msk.f32.gmra.mrb[22].mxu1 %vm731_vm2, %v8304_v7 }
 0x264   : > { %6322 = vmatprep.mubr.msk.f32.mxu1 %vm731_vm2, %v8305_v17 }
 0x265   : > { %v7967_v18 = vpop.f32.mrb[48].mxu0 }
 0x266   : > { %v7969_v19 = vpop.f32.mrb[49].mxu0 }
 0x267   : > { %6323 = vmatmul.mubr.msk.f32.gmra.mrb[24].mxu1 %vm731_vm2, %v8306_v25 }
 0x268   : > { %6325 = vmatprep.mubr.msk.f32.mxu1 %vm731_vm2, %v7677_v3  ;;  %v3883_v3 = vld [vmem:[#allocation2 + $0x1a2] sm:$0xff] }
 0x269   : > { %v7975_v35 = vpop.f32.mrb[50].mxu0 }
 0x26a   : > { %v7977_v36 = vpop.f32.mrb[51].mxu0 }
 0x26b   : > { %6326 = vmatmul.mubr.msk.f32.gmra.mrb[26].mxu1 %vm731_vm2, %v8307_v37 }
 0x26c   : > { %6328 = vmatprep.mubr.msk.f32.mxu1 %vm731_vm2, %v7689_v14 }
 0x26d   : > { %v7983_v50 = vpop.f32.mrb[52].mxu0 }
 0x26e   : > { %v7985_v55 = vpop.f32.mrb[53].mxu0 }
 0x26f   : > { %6329 = vmatmul.mubr.msk.f32.gmra.mrb[28].mxu1 %vm731_vm2, %v7695_v61 }
 0x270   : > { %6331 = vmatprep.mubr.msk.f32.mxu1 %vm731_vm2, %v3882_v39 }
 0x271   : > { %v7990_v57 = vpop.f32.mrb[54].mxu0 }
 0x272   : > { %v7992_v59 = vpop.f32.mrb[55].mxu0 }
 0x273   : > { %6332 = vmatmul.mubr.msk.f32.gmra.mrb[30].mxu1 %vm731_vm2, %v3883_v3 }
 0x275   : > { %v7995_v13 = vpop.f32.mrb[56].mxu0 }
 0x276   : > { %v7997_v14 = vpop.f32.mrb[57].mxu0 }
 0x279   : > { %v7999_v15 = vpop.f32.mrb[58].mxu0 }
 0x27a   : > { %v8001_v16 = vpop.f32.mrb[59].mxu0 }
 0x27d   : > { %v8003_v26 = vpop.f32.mrb[60].mxu0 }
 0x27e   : > { %v8005_v61 = vpop.f32.mrb[61].mxu0 }
 0x281   : > { %v8007_v44 = vpop.f32.mrb[62].mxu0 }
 0x282   : > { %v8009_v46 = vpop.f32.mrb[63].mxu0 }
 0x30a   : > { %v6288_v47 = vpop.f32.mrb[0].mxu1 }
 0x30b   : > { %v6434_v9 = vadd.f32 %v6288_v47, %v5988_v28  ;;  %v4048_v23 = vpop.f32.mrb[1].mxu1 }
 0x30c   : > { %v6435_v27 = vadd.f32 %v4048_v23, %v1725_v54 }
 0x30d   : > { %v4247_v29 = vadd.f32 %v6434_v9, %v8014_v49 }
 0x30e   : > { %v4246_v48 = vadd.f32 %v6435_v27, %v8014_v49  ;;  %v6291_v40 = vpop.f32.mrb[2].mxu1 }
 0x30f   : > { %v6436_v58 = vadd.f32 %v6291_v40, %v5991_v1  ;;  %v4058_v60 = vpop.f32.mrb[3].mxu1  ;;  %v4279_v33 = vmax.f32 %v4247_v29, 0.0 }
 0x310   : > { %v4278_v6 = vmax.f32 %v4246_v48, 0.0  ;;  %v6437_v8 = vadd.f32 %v4058_v60, %v7913_v4 }
 0x311   : > { %v4249_v63 = vadd.f32 %v6436_v58, %v8014_v49 }
 0x312   : > { %v4248_v20 = vadd.f32 %v6437_v8, %v8014_v49  ;;  %v6294_v24 = vpop.f32.mrb[4].mxu1  ;;  %6386 = vmatprep.mubr.msk.f32.mxu0 %vm731_vm2, %v4278_v6 }
 0x313   : > { %v6438_v28 = vadd.f32 %v6294_v24, %v7919_v30  ;;  %v4068_v54 = vpop.f32.mrb[5].mxu1  ;;  %6387 = vmatmul.mubr.msk.f32.vlgmr.msra.gmra.mrb[64].mxu0 %vm731_vm2, %v4279_v33  ;;  %v4281_v0 = vmax.f32 %v4249_v63, 0.0 }
 0x314   : > { %v4280_v38 = vmax.f32 %v4248_v20, 0.0  ;;  %v6439_v1 = vadd.f32 %v4068_v54, %v7921_v34 }
 0x315   : > { %v4251_v12 = vadd.f32 %v6438_v28, %v8014_v49 }
 0x316   : > { %v4250_v4 = vadd.f32 %v6439_v1, %v8014_v49  ;;  %v6297_v21 = vpop.f32.mrb[6].mxu1  ;;  %6389 = vmatprep.mubr.msk.f32.mxu0 %vm731_vm2, %v4280_v38 }
 0x317   : > { %v6440_v32 = vadd.f32 %v6297_v21, %v7927_v10  ;;  %v4078_v42 = vpop.f32.mrb[7].mxu1  ;;  %6390 = vmatmul.mubr.msk.f32.gmra.mrb[66].mxu0 %vm731_vm2, %v4281_v0  ;;  %v4283_v41 = vmax.f32 %v4251_v12, 0.0 }
 0x318   : > { %v4282_v30 = vmax.f32 %v4250_v4, 0.0  ;;  %v6441_v53 = vadd.f32 %v4078_v42, %v7929_v11 }
 0x319   : > { %v4253_v2 = vadd.f32 %v6440_v32, %v8014_v49 }
 0x31a   : > { %v4252_v34 = vadd.f32 %v6441_v53, %v8014_v49  ;;  %v6300_v56 = vpop.f32.mrb[8].mxu1  ;;  %6392 = vmatprep.mubr.msk.f32.mxu0 %vm731_vm2, %v4282_v30 }
 0x31b   : > { %v6442_v7 = vadd.f32 %v6300_v56, %v7935_v22  ;;  %v4088_v17 = vpop.f32.mrb[9].mxu1  ;;  %6393 = vmatmul.mubr.msk.f32.gmra.mrb[68].mxu0 %vm731_vm2, %v4283_v41  ;;  %v4285_v37 = vmax.f32 %v4253_v2, 0.0 }
 0x31c   : > { %v4284_v10 = vmax.f32 %v4252_v34, 0.0  ;;  %v6443_v25 = vadd.f32 %v4088_v17, %v7937_v31 }
 0x31d   : > { %v4255_v39 = vadd.f32 %v6442_v7, %v8014_v49 }
 0x31e   : > { %v4254_v11 = vadd.f32 %v6443_v25, %v8014_v49  ;;  %v6303_v3 = vpop.f32.mrb[10].mxu1  ;;  %6395 = vmatprep.mubr.msk.f32.mxu0 %vm731_vm2, %v4284_v10 }
 0x31f   : > { %v6444_v47 = vadd.f32 %v6303_v3, %v7943_v43  ;;  %v4098_v9 = vpop.f32.mrb[11].mxu1  ;;  %6396 = vmatmul.mubr.msk.f32.gmra.mrb[70].mxu0 %vm731_vm2, %v4285_v37  ;;  %v4287_v27 = vmax.f32 %v4255_v39, 0.0 }
 0x320   : > { %v4286_v22 = vmax.f32 %v4254_v11, 0.0  ;;  %v6445_v23 = vadd.f32 %v4098_v9, %v7945_v52 }
 0x321   : > { %v4257_v29 = vadd.f32 %v6444_v47, %v8014_v49 }
 0x322   : > { %v4256_v31 = vadd.f32 %v6445_v23, %v8014_v49  ;;  %v6306_v48 = vpop.f32.mrb[12].mxu1  ;;  %6398 = vmatprep.mubr.msk.f32.mxu0 %vm731_vm2, %v4286_v22 }
 0x323   : > { %v6446_v40 = vadd.f32 %v6306_v48, %v7951_v45  ;;  %v4108_v58 = vpop.f32.mrb[13].mxu1  ;;  %6399 = vmatmul.mubr.msk.f32.gmra.mrb[72].mxu0 %vm731_vm2, %v4287_v27  ;;  %v4289_v6 = vmax.f32 %v4257_v29, 0.0 }
 0x324   : > { %v4288_v43 = vmax.f32 %v4256_v31, 0.0  ;;  %v6447_v60 = vadd.f32 %v4108_v58, %v7953_v51 }
 0x325   : > { %v4259_v8 = vadd.f32 %v6446_v40, %v8014_v49 }
 0x326   : > { %v4258_v52 = vadd.f32 %v6447_v60, %v8014_v49  ;;  %v6309_v33 = vpop.f32.mrb[14].mxu1  ;;  %6401 = vmatprep.mubr.msk.f32.mxu0 %vm731_vm2, %v4288_v43 }
 0x327   : > { %v6448_v63 = vadd.f32 %v6309_v33, %v7959_v62  ;;  %v4118_v20 = vpop.f32.mrb[15].mxu1  ;;  %6402 = vmatmul.mubr.msk.f32.gmra.mrb[74].mxu0 %vm731_vm2, %v4289_v6  ;;  %v4291_v28 = vmax.f32 %v4259_v8, 0.0 }
 0x328   : > { %v4290_v45 = vmax.f32 %v4258_v52, 0.0  ;;  %v6449_v24 = vadd.f32 %v4118_v20, %v7961_v5 }
 0x329   : > { %v4261_v54 = vadd.f32 %v6448_v63, %v8014_v49 }
 0x32a   : > { %v4260_v51 = vadd.f32 %v6449_v24, %v8014_v49  ;;  %v6312_v38 = vpop.f32.mrb[16].mxu1  ;;  %6404 = vmatprep.mubr.msk.f32.mxu0 %vm731_vm2, %v4290_v45 }
 0x32b   : > { %v6450_v1 = vadd.f32 %v6312_v38, %v7967_v18  ;;  %v4128_v0 = vpop.f32.mrb[17].mxu1  ;;  %6405 = vmatmul.mubr.msk.f32.gmra.mrb[76].mxu0 %vm731_vm2, %v4291_v28  ;;  %v4293_v4 = vmax.f32 %v4261_v54, 0.0 }
 0x32c   : > { %v4292_v62 = vmax.f32 %v4260_v51, 0.0  ;;  %v6451_v12 = vadd.f32 %v4128_v0, %v7969_v19 }
 0x32d   : > { %v4263_v21 = vadd.f32 %v6450_v1, %v8014_v49 }
 0x32e   : > { %v4262_v5 = vadd.f32 %v6451_v12, %v8014_v49  ;;  %v6315_v32 = vpop.f32.mrb[18].mxu1  ;;  %6407 = vmatprep.mubr.msk.f32.mxu0 %vm731_vm2, %v4292_v62 }
 0x32f   : > { %v6452_v42 = vadd.f32 %v6315_v32, %v7975_v35  ;;  %v4138_v30 = vpop.f32.mrb[19].mxu1  ;;  %6408 = vmatmul.mubr.msk.f32.gmra.mrb[78].mxu0 %vm731_vm2, %v4293_v4  ;;  %v4295_v41 = vmax.f32 %v4263_v21, 0.0 }
 0x330   : > { %v4294_v18 = vmax.f32 %v4262_v5, 0.0  ;;  %v6453_v53 = vadd.f32 %v4138_v30, %v7977_v36 }
 0x331   : > { %v4265_v2 = vadd.f32 %v6452_v42, %v8014_v49 }
 0x332   : > { %v4264_v19 = vadd.f32 %v6453_v53, %v8014_v49  ;;  %v6318_v34 = vpop.f32.mrb[20].mxu1  ;;  %6410 = vmatprep.mubr.msk.f32.mxu0 %vm731_vm2, %v4294_v18 }
 0x333   : > { %v6454_v56 = vadd.f32 %v6318_v34, %v7983_v50  ;;  %v4148_v7 = vpop.f32.mrb[21].mxu1  ;;  %6411 = vmatmul.mubr.msk.f32.gmra.mrb[80].mxu0 %vm731_vm2, %v4295_v41  ;;  %v4297_v10 = vmax.f32 %v4265_v2, 0.0 }
 0x334   : > { %v4296_v35 = vmax.f32 %v4264_v19, 0.0  ;;  %v6455_v17 = vadd.f32 %v4148_v7, %v7985_v55 }
 0x335   : > { %v4267_v25 = vadd.f32 %v6454_v56, %v8014_v49 }
 0x336   : > { %v4266_v36 = vadd.f32 %v6455_v17, %v8014_v49  ;;  %v6321_v37 = vpop.f32.mrb[22].mxu1  ;;  %6413 = vmatprep.mubr.msk.f32.mxu0 %vm731_vm2, %v4296_v35 }
 0x337   : > { %v6456_v39 = vadd.f32 %v6321_v37, %v7990_v57  ;;  %v4158_v11 = vpop.f32.mrb[23].mxu1  ;;  %6414 = vmatmul.mubr.msk.f32.gmra.mrb[82].mxu0 %vm731_vm2, %v4297_v10  ;;  %v4299_v47 = vmax.f32 %v4267_v25, 0.0 }
 0x338   : > { %v4298_v50 = vmax.f32 %v4266_v36, 0.0  ;;  %v6457_v3 = vadd.f32 %v4158_v11, %v7992_v59 }
 0x339   : > { %v4269_v9 = vadd.f32 %v6456_v39, %v8014_v49 }
 0x33a   : > { %v4268_v55 = vadd.f32 %v6457_v3, %v8014_v49  ;;  %v6324_v22 = vpop.f32.mrb[24].mxu1  ;;  %6416 = vmatprep.mubr.msk.f32.mxu0 %vm731_vm2, %v4298_v50 }
 0x33b   : > { %v6458_v23 = vadd.f32 %v6324_v22, %v7995_v13  ;;  %v4168_v27 = vpop.f32.mrb[25].mxu1  ;;  %6417 = vmatmul.mubr.msk.f32.gmra.mrb[84].mxu0 %vm731_vm2, %v4299_v47  ;;  %v4301_v31 = vmax.f32 %v4269_v9, 0.0 }
 0x33c   : > { %v4300_v57 = vmax.f32 %v4268_v55, 0.0  ;;  %v6459_v29 = vadd.f32 %v4168_v27, %v7997_v14 }
 0x33d   : > { %v4271_v48 = vadd.f32 %v6458_v23, %v8014_v49 }
 0x33e   : > { %v4270_v59 = vadd.f32 %v6459_v29, %v8014_v49  ;;  %v6327_v40 = vpop.f32.mrb[26].mxu1  ;;  %6419 = vmatprep.mubr.msk.f32.mxu0 %vm731_vm2, %v4300_v57 }
 0x33f   : > { %v6460_v58 = vadd.f32 %v6327_v40, %v7999_v15  ;;  %v4178_v43 = vpop.f32.mrb[27].mxu1  ;;  %6420 = vmatmul.mubr.msk.f32.gmra.mrb[86].mxu0 %vm731_vm2, %v4301_v31  ;;  %v4303_v6 = vmax.f32 %v4271_v48, 0.0 }
 0x340   : > { %v4302_v13 = vmax.f32 %v4270_v59, 0.0  ;;  %v6461_v60 = vadd.f32 %v4178_v43, %v8001_v16 }
 0x341   : > { %v4273_v8 = vadd.f32 %v6460_v58, %v8014_v49 }
 0x342   : > { %v4272_v14 = vadd.f32 %v6461_v60, %v8014_v49  ;;  %v6330_v52 = vpop.f32.mrb[28].mxu1  ;;  %6422 = vmatprep.mubr.msk.f32.mxu0 %vm731_vm2, %v4302_v13 }
 0x343   : > { %v6462_v33 = vadd.f32 %v6330_v52, %v8003_v26  ;;  %v4188_v63 = vpop.f32.mrb[29].mxu1  ;;  %6423 = vmatmul.mubr.msk.f32.gmra.mrb[88].mxu0 %vm731_vm2, %v4303_v6  ;;  %v4305_v45 = vmax.f32 %v4273_v8, 0.0 }
 0x344   : > { %v4304_v15 = vmax.f32 %v4272_v14, 0.0  ;;  %v6463_v20 = vadd.f32 %v4188_v63, %v8005_v61 }
 0x345   : > { %v4275_v24 = vadd.f32 %v6462_v33, %v8014_v49 }
 0x346   : > { %v4274_v16 = vadd.f32 %v6463_v20, %v8014_v49  ;;  %v6333_v28 = vpop.f32.mrb[30].mxu1  ;;  %6425 = vmatprep.mubr.msk.f32.mxu0 %vm731_vm2, %v4304_v15 }
 0x347   : > { %v6464_v54 = vadd.f32 %v6333_v28, %v8007_v44  ;;  %v4198_v51 = vpop.f32.mrb[31].mxu1  ;;  %6426 = vmatmul.mubr.msk.f32.gmra.mrb[90].mxu0 %vm731_vm2, %v4305_v45  ;;  %v4307_v1 = vmax.f32 %v4275_v24, 0.0  ;;  %v5367_v44 = vld [vmem:[%s8229_s8] ss:$0 sm:$0xff] }
 0x348   : > { %v4306_v26 = vmax.f32 %v4274_v16, 0.0  ;;  %v6465_v38 = vadd.f32 %v4198_v51, %v8009_v46  ;;  %v5401_v46 = vld [vmem:[%s8227_s6] ss:$0 sm:$0xff] }
 0x349   : > { %v4277_v0 = vadd.f32 %v6464_v54, %v8014_v49  ;;  %v8115_v21 = vadd.f32 %v5401_v46, %v5367_v44 }
 0x34a   : > { %v4276_v61 = vadd.f32 %v6465_v38, %v8014_v49  ;;  %6428 = vmatprep.mubr.msk.f32.mxu0 %vm731_vm2, %v4306_v26 }
 0x34b   : > { %6429 = vmatmul.mubr.msk.f32.gmra.mrb[92].mxu0 %vm731_vm2, %v4307_v1  ;;  %v4309_v12 = vmax.f32 %v4277_v0, 0.0 }
 0x34c   : > { %v4308_v62 = vmax.f32 %v4276_v61, 0.0 }
 0x34e   : > { %6431 = vmatprep.mubr.msk.f32.mxu0 %vm731_vm2, %v4308_v62 }
 0x34f   : > { %6432 = vmatmul.mubr.msk.f32.gmra.mrb[94].mxu0 %vm731_vm2, %v4309_v12 }
 0x3e6   : > { %v6388_v4 = vpop.f32.mrb[64].mxu0 }
 0x3e7   : > { %v6466_v49 = vadd.f32 %v6388_v4, %v5367_v44  ;;  %v4716_v5 = vpop.f32.mrb[65].mxu0 }
 0x3e8   : > { %v6468_v32 = vadd.f32 %v5367_v44, %v4716_v5 }
 0x3e9   : > { %v6467_v42 = vadd.f32 %v6466_v49, %v5401_v46 }
 0x3ea   : > { %v6469_v30 = vadd.f32 %v6468_v32, %v5401_v46  ;;  %v6391_v18 = vpop.f32.mrb[66].mxu0 }
 0x3eb   : > { %v4908_v53 = vmax.f32 %v6467_v42, 0.0  ;;  %v6471_v41 = vadd.f32 %v8115_v21, %v6391_v18  ;;  %v4726_v2 = vpop.f32.mrb[67].mxu0 }
 0x3ec   : > { %v4907_v19 = vmax.f32 %v6469_v30, 0.0  ;;  %v6473_v34 = vadd.f32 %v8115_v21, %v4726_v2 }
 0x3ed   : > { %4941 = vst.msk [vmem:[%s8122_s12 + $0x8] sm:$0xff] %vm4939_vm4, %v4908_v53  ;;  %v4910_v56 = vmax.f32 %v6471_v41, 0.0 }
 0x3ee   : > { %4940 = vst.msk [vmem:[%s8122_s12] sm:$0xff] %vm4939_vm4, %v4907_v19  ;;  %v4909_v7 = vmax.f32 %v6473_v34, 0.0  ;;  %v6394_v35 = vpop.f32.mrb[68].mxu0 }
 0x3ef   : > { %4943 = vst.msk [vmem:[%s8122_s12 + $0x18] sm:$0xff] %vm4939_vm4, %v4910_v56  ;;  %v6475_v17 = vadd.f32 %v8115_v21, %v6394_v35  ;;  %v4736_v10 = vpop.f32.mrb[69].mxu0 }
 0x3f0   : > { %4942 = vst.msk [vmem:[%s8122_s12 + $0x10] sm:$0xff] %vm4939_vm4, %v4909_v7  ;;  %v6477_v25 = vadd.f32 %v8115_v21, %v4736_v10 }
 0x3f1   : > { %v4912_v36 = vmax.f32 %v6475_v17, 0.0 }
 0x3f2   : > { %v4911_v37 = vmax.f32 %v6477_v25, 0.0  ;;  %v6397_v39 = vpop.f32.mrb[70].mxu0 }
 0x3f3   : > { %4945 = vst.msk [vmem:[%s8122_s12 + $0x28] sm:$0xff] %vm4939_vm4, %v4912_v36  ;;  %v6479_v11 = vadd.f32 %v8115_v21, %v6397_v39  ;;  %v4746_v50 = vpop.f32.mrb[71].mxu0 }
 0x3f4   : > { %4944 = vst.msk [vmem:[%s8122_s12 + $0x20] sm:$0xff] %vm4939_vm4, %v4911_v37  ;;  %v6481_v3 = vadd.f32 %v8115_v21, %v4746_v50 }
 0x3f5   : > { %v4914_v47 = vmax.f32 %v6479_v11, 0.0 }
 0x3f6   : > { %v4913_v9 = vmax.f32 %v6481_v3, 0.0  ;;  %v6400_v55 = vpop.f32.mrb[72].mxu0 }
 0x3f7   : > { %4947 = vst.msk [vmem:[%s8122_s12 + $0x38] sm:$0xff] %vm4939_vm4, %v4914_v47  ;;  %v6483_v22 = vadd.f32 %v8115_v21, %v6400_v55  ;;  %v4756_v23 = vpop.f32.mrb[73].mxu0 }
 0x3f8   : > { %4946 = vst.msk [vmem:[%s8122_s12 + $0x30] sm:$0xff] %vm4939_vm4, %v4913_v9  ;;  %v6485_v27 = vadd.f32 %v8115_v21, %v4756_v23 }
 0x3f9   : > { %v4916_v57 = vmax.f32 %v6483_v22, 0.0 }
 0x3fa   : > { %v4915_v29 = vmax.f32 %v6485_v27, 0.0  ;;  %v6403_v31 = vpop.f32.mrb[74].mxu0 }
 0x3fb   : > { %4949 = vst.msk [vmem:[%s8122_s12 + $0x48] sm:$0xff] %vm4939_vm4, %v4916_v57  ;;  %v6487_v48 = vadd.f32 %v8115_v21, %v6403_v31  ;;  %v4766_v59 = vpop.f32.mrb[75].mxu0 }
 0x3fc   : > { %4948 = vst.msk [vmem:[%s8122_s12 + $0x40] sm:$0xff] %vm4939_vm4, %v4915_v29  ;;  %v6489_v40 = vadd.f32 %v8115_v21, %v4766_v59 }
 0x3fd   : > { %v4918_v58 = vmax.f32 %v6487_v48, 0.0 }
 0x3fe   : > { %v4917_v43 = vmax.f32 %v6489_v40, 0.0  ;;  %v6406_v13 = vpop.f32.mrb[76].mxu0 }
 0x3ff   : > { %4951 = vst.msk [vmem:[%s8122_s12 + $0x58] sm:$0xff] %vm4939_vm4, %v4918_v58  ;;  %v6491_v60 = vadd.f32 %v8115_v21, %v6406_v13  ;;  %v4776_v6 = vpop.f32.mrb[77].mxu0 }
 0x400   : > { %4950 = vst.msk [vmem:[%s8122_s12 + $0x50] sm:$0xff] %vm4939_vm4, %v4917_v43  ;;  %v6493_v8 = vadd.f32 %v8115_v21, %v4776_v6 }
 0x401   : > { %v4920_v14 = vmax.f32 %v6491_v60, 0.0 }
 0x402   : > { %v4919_v52 = vmax.f32 %v6493_v8, 0.0  ;;  %v6409_v33 = vpop.f32.mrb[78].mxu0 }
 0x403   : > { %4953 = vst.msk [vmem:[%s8122_s12 + $0x68] sm:$0xff] %vm4939_vm4, %v4920_v14  ;;  %v6495_v63 = vadd.f32 %v8115_v21, %v6409_v33  ;;  %v4786_v15 = vpop.f32.mrb[79].mxu0 }
 0x404   : > { %4952 = vst.msk [vmem:[%s8122_s12 + $0x60] sm:$0xff] %vm4939_vm4, %v4919_v52  ;;  %v6497_v20 = vadd.f32 %v8115_v21, %v4786_v15 }
 0x405   : > { %v4922_v45 = vmax.f32 %v6495_v63, 0.0 }
 0x406   : > { %v4921_v24 = vmax.f32 %v6497_v20, 0.0  ;;  %v6412_v16 = vpop.f32.mrb[80].mxu0 }
 0x407   : > { %4955 = vst.msk [vmem:[%s8122_s12 + $0x78] sm:$0xff] %vm4939_vm4, %v4922_v45  ;;  %v6499_v28 = vadd.f32 %v8115_v21, %v6412_v16  ;;  %v4796_v54 = vpop.f32.mrb[81].mxu0 }
 0x408   : > { %4954 = vst.msk [vmem:[%s8122_s12 + $0x70] sm:$0xff] %vm4939_vm4, %v4921_v24  ;;  %v6501_v51 = vadd.f32 %v8115_v21, %v4796_v54 }
 0x409   : > { %v4924_v26 = vmax.f32 %v6499_v28, 0.0 }
 0x40a   : > { %v4923_v38 = vmax.f32 %v6501_v51, 0.0  ;;  %v6415_v1 = vpop.f32.mrb[82].mxu0 }
 0x40b   : > { %4957 = vst.msk [vmem:[%s8122_s12 + $0x88] sm:$0xff] %vm4939_vm4, %v4924_v26  ;;  %v6503_v0 = vadd.f32 %v8115_v21, %v6415_v1  ;;  %v4806_v61 = vpop.f32.mrb[83].mxu0 }
 0x40c   : > { %4956 = vst.msk [vmem:[%s8122_s12 + $0x80] sm:$0xff] %vm4939_vm4, %v4923_v38  ;;  %v6505_v62 = vadd.f32 %v8115_v21, %v4806_v61 }
 0x40d   : > { %v4926_v12 = vmax.f32 %v6503_v0, 0.0 }
 0x40e   : > { %v4925_v44 = vmax.f32 %v6505_v62, 0.0  ;;  %v6418_v46 = vpop.f32.mrb[84].mxu0 }
 0x40f   : > { %4959 = vst.msk [vmem:[%s8122_s12 + $0x98] sm:$0xff] %vm4939_vm4, %v4926_v12  ;;  %v6507_v4 = vadd.f32 %v8115_v21, %v6418_v46  ;;  %v4816_v49 = vpop.f32.mrb[85].mxu0 }
 0x410   : > { %4958 = vst.msk [vmem:[%s8122_s12 + $0x90] sm:$0xff] %vm4939_vm4, %v4925_v44  ;;  %v6509_v5 = vadd.f32 %v8115_v21, %v4816_v49 }
 0x411   : > { %v4928_v32 = vmax.f32 %v6507_v4, 0.0 }
 0x412   : > { %v4927_v42 = vmax.f32 %v6509_v5, 0.0  ;;  %v6421_v30 = vpop.f32.mrb[86].mxu0 }
 0x413   : > { %4961 = vst.msk [vmem:[%s8122_s12 + $0xa8] sm:$0xff] %vm4939_vm4, %v4928_v32  ;;  %v6511_v18 = vadd.f32 %v8115_v21, %v6421_v30  ;;  %v4826_v53 = vpop.f32.mrb[87].mxu0 }
 0x414   : > { %4960 = vst.msk [vmem:[%s8122_s12 + $0xa0] sm:$0xff] %vm4939_vm4, %v4927_v42  ;;  %v6513_v41 = vadd.f32 %v8115_v21, %v4826_v53 }
 0x415   : > { %v4930_v2 = vmax.f32 %v6511_v18, 0.0 }
 0x416   : > { %v4929_v19 = vmax.f32 %v6513_v41, 0.0  ;;  %v6424_v34 = vpop.f32.mrb[88].mxu0 }
 0x417   : > { %4963 = vst.msk [vmem:[%s8122_s12 + $0xb8] sm:$0xff] %vm4939_vm4, %v4930_v2  ;;  %v6515_v56 = vadd.f32 %v8115_v21, %v6424_v34  ;;  %v4836_v7 = vpop.f32.mrb[89].mxu0 }
 0x418   : > { %4962 = vst.msk [vmem:[%s8122_s12 + $0xb0] sm:$0xff] %vm4939_vm4, %v4929_v19  ;;  %v6517_v35 = vadd.f32 %v8115_v21, %v4836_v7 }
 0x419   : > { %v4932_v17 = vmax.f32 %v6515_v56, 0.0 }
 0x41a   : > { %v4931_v10 = vmax.f32 %v6517_v35, 0.0  ;;  %v6427_v25 = vpop.f32.mrb[90].mxu0 }
 0x41b   : > { %4965 = vst.msk [vmem:[%s8122_s12 + $0xc8] sm:$0xff] %vm4939_vm4, %v4932_v17  ;;  %v6519_v36 = vadd.f32 %v8115_v21, %v6427_v25  ;;  %v4846_v37 = vpop.f32.mrb[91].mxu0 }
 0x41c   : > { %4964 = vst.msk [vmem:[%s8122_s12 + $0xc0] sm:$0xff] %vm4939_vm4, %v4931_v10  ;;  %v6521_v39 = vadd.f32 %v8115_v21, %v4846_v37 }
 0x41d   : > { %v4934_v11 = vmax.f32 %v6519_v36, 0.0 }
 0x41e   : > { %v4933_v50 = vmax.f32 %v6521_v39, 0.0  ;;  %v6430_v3 = vpop.f32.mrb[92].mxu0 }
 0x41f   : > { %4967 = vst.msk [vmem:[%s8122_s12 + $0xd8] sm:$0xff] %vm4939_vm4, %v4934_v11  ;;  %v6523_v47 = vadd.f32 %v8115_v21, %v6430_v3  ;;  %v4856_v9 = vpop.f32.mrb[93].mxu0 }
 0x420   : > { %4966 = vst.msk [vmem:[%s8122_s12 + $0xd0] sm:$0xff] %vm4939_vm4, %v4933_v50  ;;  %v6525_v55 = vadd.f32 %v8115_v21, %v4856_v9 }
 0x421   : > { %v4936_v22 = vmax.f32 %v6523_v47, 0.0 }
 0x422   : > { %v4935_v23 = vmax.f32 %v6525_v55, 0.0  ;;  %v6433_v27 = vpop.f32.mrb[94].mxu0 }
 0x423   : > { %4969 = vst.msk [vmem:[%s8122_s12 + $0xe8] sm:$0xff] %vm4939_vm4, %v4936_v22  ;;  %v6527_v57 = vadd.f32 %v8115_v21, %v6433_v27  ;;  %v4866_v29 = vpop.f32.mrb[95].mxu0 }
 0x424   : > { %4968 = vst.msk [vmem:[%s8122_s12 + $0xe0] sm:$0xff] %vm4939_vm4, %v4935_v23  ;;  %v6529_v31 = vadd.f32 %v8115_v21, %v4866_v29 }
 0x425   : > { %v4938_v48 = vmax.f32 %v6527_v57, 0.0 }
 0x426   : > { %v4937_v59 = vmax.f32 %v6529_v31, 0.0 }
 0x427   : > { %4971 = vst.msk [vmem:[%s8122_s12 + $0xf8] sm:$0xff] %vm4939_vm4, %v4938_v48 }
 0x428   : > { %4970 = vst.msk [vmem:[%s8122_s12 + $0xf0] sm:$0xff] %vm4939_vm4, %v4937_v59 }
 0x429 PF: > { %s19_s30 = sadd.s32 1, %s6833_s30  }
 0x42a   : > { %p16_p4 = scmp.ge.s32.totalorder %s19_s30, 4  }
 0x42c   :  { %18 = sbr.rel (!%p16_p4) target bundleno = 1 (0x1), region = 96 }

</bundles_post_ra>
